<compile_context>
chip_gen: v7x
topology: tpu7x:2x2x1
jax: 0.10.0
libtpu: 0.0.40
codegen_flags: <defaults>
</compile_context>

<pallas_src>
import functools

import jax
import jax.numpy as jnp
from jax import lax
from jax.experimental import pallas as pl
from jax.experimental.pallas import tpu as pltpu

EPS = 1e-5
_MXU_MIN_CONTRACT = 16   # use the MXU for a 1x1 conv only if its contraction dim >= this
# TODO(synk): GLayerNorm source not shown in the snippet; assumed TasNet-style gLN
# (global (C, L) stats per sample, per-channel affine, eps=1e-5, biased variance), consistent
# with the transpose that follows it in forward(). nn.PReLU() default (single shared alpha).


def _tconv_block_kernel(x_ref, w1_ref, b1_ref, w2_ref, b2_ref,
                        wdw_ref, bdw_ref, gamma_ref, beta_ref, alpha_ref,
                        o_ref, *, ksize, dilation, pad, length, lpad, bt):
    f32 = jnp.float32
    alpha = alpha_ref[0]                                   # shared PReLU slope (SMEM scalar)
    w1 = w1_ref[...].astype(f32)                           # (Co, Ci)
    b1 = b1_ref[...].astype(f32)                           # (Co, 1)
    w2 = w2_ref[...].astype(f32)                           # (Ci, Co)
    b2 = b2_ref[...].astype(f32)                           # (Ci, 1)
    wdw = wdw_ref[...].astype(f32)                         # (Co, K)
    bdw = bdw_ref[...].astype(f32)                         # (Co, 1)
    gamma = gamma_ref[...].astype(f32)                     # (Co, 1)
    beta = beta_ref[...].astype(f32)                       # (Co, 1)
    co, ci = w1.shape

    # Loop-invariant values, hoisted out of the per-sample loop (broadcasts are not CSE'd).
    pos = lax.broadcasted_iota(jnp.int32, (1, lpad), 1)    # lane positions within a sample
    padded = length != lpad
    lane_valid = (pos < length) if padded else None
    ones_mat = jnp.ones((lpad, 128), f32)                  # MXU ones for lane reductions
    inv_count = 1.0 / (co * length)
    use_mxu_pw1 = ci >= _MXU_MIN_CONTRACT
    use_mxu_pw2 = co >= _MXU_MIN_CONTRACT

    @pl.loop(0, bt, unroll=bt <= 4)
    def _(b):
        x = x_ref[b].astype(f32)                           # (Ci, Lp)

        # ---- pwConv1 (1x1) + PReLU -------------------------------------------------
        if use_mxu_pw1:
            h = jnp.dot(w1, x, preferred_element_type=f32)
        else:                                              # VPU broadcast MACs; skip the MXU
            h = w1[:, 0:1] * x[0:1, :]
            for c in range(1, ci):
                h = h + w1[:, c:c + 1] * x[c:c + 1, :]
        h = h + b1
        h = jnp.where(h > 0, h, alpha * h)

        # ---- GLayerNorm: global (C, L) stats, two-pass centered, reductions on MXU --
        hm = jnp.where(lane_valid, h, 0.0) if padded else h
        s1 = jnp.sum(jnp.dot(hm, ones_mat, preferred_element_type=f32)[:, 0:1])
        mean = s1 * inv_count
        d = h - mean
        dm = jnp.where(lane_valid, d, 0.0) if padded else d
        s2 = jnp.sum(jnp.dot(dm * dm, ones_mat, preferred_element_type=f32)[:, 0:1])
        rstd = lax.rsqrt(s2 * inv_count + EPS)
        h = d * rstd * gamma + beta

        # ---- depthwise dilated conv ('same') + PReLU ---------------------------------
        acc = None
        for k in range(ksize):
            shift = k * dilation - pad                     # source offset of tap k
            if shift == 0:
                tap = h                                    # always in-range at valid outputs
            else:
                rolled = pltpu.roll(h, (-shift) % lpad, axis=1)
                edge = (pos >= -shift) if shift < 0 else (pos < length - shift)
                tap = jnp.where(edge, rolled, 0.0)
            term = wdw[:, k:k + 1] * tap
            acc = term if acc is None else acc + term
        acc = acc + bdw
        h = jnp.where(acc > 0, acc, alpha * acc)           # same shared PReLU alpha

        # ---- pwConv2 (1x1) + residual ------------------------------------------------
        if use_mxu_pw2:
            y = jnp.dot(w2, h, preferred_element_type=f32)
        else:
            y = w2[:, 0:1] * h[0:1, :]
            for c in range(1, co):
                y = y + w2[:, c:c + 1] * h[c:c + 1, :]
        y = y + b2
        o_ref[b] = (x + y).astype(o_ref.dtype)
    # NOTE: at production sizes (Co~64-128, very long L) the post-GLN phase could further be
    # chunked over lane sub-blocks; unnecessary at these channel counts.


def _work_bytes(ci, co, lpad):
    """Per-sample live f32 working slabs inside the kernel loop + the MXU ones matrix."""
    return (24 * max(8, ci, co) + 128) * lpad * 4


def _tpu_config():
    """Best-effort (tensorcores per chip, per-core VMEM bytes) with safe fallbacks."""
    num_tc = 1
    vmem = None
    try:
        vmem = int(pltpu.get_tpu_info().vmem_capacity_bytes)
    except Exception:
        pass
    try:
        kind = jax.devices()[0].device_kind.lower()
    except Exception:
        kind = ""
    if "v7" in kind:
        num_tc = 2
        vmem = min(vmem or (64 << 20), 64 << 20)           # 64 MiB per TC on v7x
    elif vmem is None:
        vmem = (128 << 20) if any(v in kind for v in ("v4", "v5", "v6")) else (64 << 20)
    return num_tc, vmem


def _pick_bt(batch, ci, co, lpad, itemsize, num_tc, vmem_bytes):
    """VMEM- and TensorCore-aware batch tile.

    Largest divisor of `batch` whose double-buffered in/out pipeline buffers fit ~45% of VMEM,
    keeping >= 2 grid steps per TensorCore on multi-TC chips (a single step is allowed on 1-TC
    v5e/v6e, where extra grid steps are pure sequential overhead). Prefers a grid divisible by
    the number of TensorCores.
    """
    per_seg = 4 * ci * lpad * itemsize                     # 2x in-buf + 2x out-buf per sample
    budget = max(int(0.45 * vmem_bytes) - _work_bytes(ci, co, lpad), per_seg)
    bt_cap = max(1, budget // per_seg)
    min_steps = 2 * num_tc if num_tc > 1 else 1
    best, best_key = 1, (False, 0)
    for c in range(1, batch + 1):
        if batch % c or c > bt_cap:
            continue
        steps = batch // c
        if steps < min_steps:
            continue
        key = (steps % num_tc == 0, c)                     # TC-balanced grid first, then big tile
        if key > best_key:
            best, best_key = c, key
    return best


def tconv_block(x, w1, b1, w2, b2, wdw, bdw, gamma, beta, alpha, *, ksize, dilation):
    B, Ci, L = x.shape
    Co = w1.shape[0]
    pad = dilation * (ksize - 1) // 2
    Lp = ((L + 127) // 128) * 128                          # lane-dense padded length

    # Natural layout: no transposes; pad L only when it is not already 128-aligned.
    xp = x if Lp == L else jnp.pad(x, ((0, 0), (0, 0), (0, Lp - L)))

    num_tc, vmem_cap = _tpu_config()
    bt = _pick_bt(B, Ci, Co, Lp, x.dtype.itemsize, num_tc, vmem_cap)

    # Explicit VMEM limit derived from the actual tile footprint (the default scoped limit would
    # otherwise gate tile growth before physical VMEM does).
    pipeline_bytes = 4 * bt * Ci * Lp * x.dtype.itemsize
    vmem_limit = int(min(0.9 * vmem_cap,
                         max(32 << 20, 2 * (pipeline_bytes + _work_bytes(Ci, Co, Lp)))))

    # 2-D parameter tiles (sublane = channel, one lane column); shared PReLU alpha in SMEM.
    b1_2 = b1.reshape(Co, 1)
    b2_2 = b2.reshape(Ci, 1)
    bdw_2 = bdw.reshape(Co, 1)
    gamma_2 = gamma.reshape(Co, 1)
    beta_2 = beta.reshape(Co, 1)
    alpha_1 = alpha.reshape(1).astype(jnp.float32)
    # (Per-channel PReLU, if ever used, would need a (C, 1) VMEM tile instead of the SMEM scalar.)

    kernel = functools.partial(_tconv_block_kernel, ksize=ksize, dilation=dilation,
                               pad=pad, length=L, lpad=Lp, bt=bt)

    def const_spec(arr):
        nd = arr.ndim
        return pl.BlockSpec(arr.shape, lambda i, _nd=nd: (0,) * _nd)

    cost = pl.CostEstimate(
        flops=int(B * L * (4 * Ci * Co + 2 * Co * ksize + 12 * Co)),
        transcendentals=int(B),
        bytes_accessed=int(x.dtype.itemsize * 2 * B * Ci * Lp
                           + 4 * (2 * Ci * Co + Co * (ksize + 4) + Ci + 1)),
    )

    outp = pl.pallas_call(
        kernel,
        out_shape=jax.ShapeDtypeStruct((B, Ci, Lp), x.dtype),
        grid=(B // bt,),
        in_specs=[
            pl.BlockSpec((bt, Ci, Lp), lambda i: (i, 0, 0)),
            const_spec(w1), const_spec(b1_2),
            const_spec(w2), const_spec(b2_2),
            const_spec(wdw), const_spec(bdw_2),
            const_spec(gamma_2), const_spec(beta_2),
            pl.BlockSpec(memory_space=pltpu.MemorySpace.SMEM),
        ],
        out_specs=pl.BlockSpec((bt, Ci, Lp), lambda i: (i, 0, 0)),
        compiler_params=pltpu.CompilerParams(
            dimension_semantics=("parallel",),
            vmem_limit_bytes=vmem_limit,
        ),
        cost_estimate=cost,
    )(xp, w1, b1_2, w2, b2_2, wdw, bdw_2, gamma_2, beta_2, alpha_1)

    return outp if Lp == L else outp[:, :, :L]


def ref_forward(x, w1, b1, w2, b2, wdw, bdw, gamma, beta, alpha, *, ksize, dilation):
    """Pure-JAX reference of the PyTorch forward (for the correctness check)."""
    pad = dilation * (ksize - 1) // 2
    L = x.shape[-1]
    a = alpha.reshape(())
    h = jnp.einsum('oc,bcl->bol', w1, x) + b1[None, :, None]
    h = jnp.where(h > 0, h, a * h)
    mean = jnp.mean(h, axis=(1, 2), keepdims=True)
    var = jnp.mean((h - mean) ** 2, axis=(1, 2), keepdims=True)
    h = (h - mean) / jnp.sqrt(var + EPS) * gamma[None, :, None] + beta[None, :, None]
    hp = jnp.pad(h, ((0, 0), (0, 0), (pad, pad)))
    acc = jnp.zeros_like(h)
    for k in range(ksize):
        off = k * dilation
        acc = acc + wdw[None, :, k:k + 1] * hp[:, :, off:off + L]
    acc = acc + bdw[None, :, None]
    h = jnp.where(acc > 0, acc, a * acc)
    y = jnp.einsum('co,bol->bcl', w2, h) + b2[None, :, None]
    return x + y


if __name__ == "__main__":
    B, Ci, Co, L = 4, 4, 8, 96        # L < 128 exercises the length-padding / mask path
    K, DIL = 3, 2

    key = jax.random.PRNGKey(0)
    keys = jax.random.split(key, 10)
    x = jax.random.normal(keys[0], (B, Ci, L), jnp.float32)
    w1 = jax.random.normal(keys[1], (Co, Ci), jnp.float32) * 0.5
    b1 = jax.random.normal(keys[2], (Co,), jnp.float32) * 0.1
    w2 = jax.random.normal(keys[3], (Ci, Co), jnp.float32) * 0.5
    b2 = jax.random.normal(keys[4], (Ci,), jnp.float32) * 0.1
    wdw = jax.random.normal(keys[5], (Co, K), jnp.float32) * 0.5
    bdw = jax.random.normal(keys[6], (Co,), jnp.float32) * 0.1
    gamma = 1.0 + 0.1 * jax.random.normal(keys[7], (Co,), jnp.float32)
    beta = 0.1 * jax.random.normal(keys[8], (Co,), jnp.float32)
    alpha = jnp.full((1,), 0.25, jnp.float32)   # PReLU default init (single shared slope)

    out = tconv_block(x, w1, b1, w2, b2, wdw, bdw, gamma, beta, alpha,
                      ksize=K, dilation=DIL)
    out = jax.block_until_ready(out)

    ref = ref_forward(x, w1, b1, w2, b2, wdw, bdw, gamma, beta, alpha,
                      ksize=K, dilation=DIL)
    assert out.shape == (B, Ci, L)
    assert jnp.allclose(out, ref, rtol=1e-4, atol=1e-4), "kernel/reference mismatch"
    print("KERNEL_OK")
</pallas_src>

<mosaic_0001>
module attributes {stable_mosaic.version = 11 : i64} {
  func.func @_tconv_block_kernel(%arg0: i32, %arg1: memref<4x4x128xf32, #tpu.memory_space<vmem>>, %arg2: memref<8x4xf32, #tpu.memory_space<vmem>>, %arg3: memref<8x1xf32, #tpu.memory_space<vmem>>, %arg4: memref<4x8xf32, #tpu.memory_space<vmem>>, %arg5: memref<4x1xf32, #tpu.memory_space<vmem>>, %arg6: memref<8x3xf32, #tpu.memory_space<vmem>>, %arg7: memref<8x1xf32, #tpu.memory_space<vmem>>, %arg8: memref<8x1xf32, #tpu.memory_space<vmem>>, %arg9: memref<8x1xf32, #tpu.memory_space<vmem>>, %arg10: memref<1xf32, #tpu.memory_space<smem>>, %arg11: memref<4x4x128xf32, #tpu.memory_space<vmem>>) attributes {dimension_semantics = [#tpu.dimension_semantics<parallel>], iteration_bounds = array<i64: 1>, scalar_prefetch = 0 : i64, scratch_operands = 0 : i64, tpu.core_type = #tpu.core_type<tc>, window_params = [{transform_indices = @transform_0, window_bounds = array<i64: 4, 4, 128>}, {pipeline_mode = #tpu.pipeline_mode<synchronous>, transform_indices = @transform_1, window_bounds = array<i64: 8, 4>}, {pipeline_mode = #tpu.pipeline_mode<synchronous>, transform_indices = @transform_2, window_bounds = array<i64: 8, 1>}, {pipeline_mode = #tpu.pipeline_mode<synchronous>, transform_indices = @transform_3, window_bounds = array<i64: 4, 8>}, {pipeline_mode = #tpu.pipeline_mode<synchronous>, transform_indices = @transform_4, window_bounds = array<i64: 4, 1>}, {pipeline_mode = #tpu.pipeline_mode<synchronous>, transform_indices = @transform_5, window_bounds = array<i64: 8, 3>}, {pipeline_mode = #tpu.pipeline_mode<synchronous>, transform_indices = @transform_6, window_bounds = array<i64: 8, 1>}, {pipeline_mode = #tpu.pipeline_mode<synchronous>, transform_indices = @transform_7, window_bounds = array<i64: 8, 1>}, {pipeline_mode = #tpu.pipeline_mode<synchronous>, transform_indices = @transform_8, window_bounds = array<i64: 8, 1>}, {transform_indices = @transform_9, window_bounds = array<i64: 1>}, {transform_indices = @transform_10, window_bounds = array<i64: 4, 4, 128>}]} {
    %c0 = arith.constant 0 : index
    %0 = memref.load %arg10[%c0] : memref<1xf32, #tpu.memory_space<smem>>
    %c0_0 = arith.constant 0 : index
    %c0_1 = arith.constant 0 : index
    %1 = vector.load %arg2[%c0_0, %c0_1] : memref<8x4xf32, #tpu.memory_space<vmem>>, vector<8x4xf32>
    %c0_2 = arith.constant 0 : index
    %c0_3 = arith.constant 0 : index
    %2 = vector.load %arg3[%c0_2, %c0_3] : memref<8x1xf32, #tpu.memory_space<vmem>>, vector<8x1xf32>
    %c0_4 = arith.constant 0 : index
    %c0_5 = arith.constant 0 : index
    %3 = vector.load %arg4[%c0_4, %c0_5] : memref<4x8xf32, #tpu.memory_space<vmem>>, vector<4x8xf32>
    %c0_6 = arith.constant 0 : index
    %c0_7 = arith.constant 0 : index
    %4 = vector.load %arg5[%c0_6, %c0_7] : memref<4x1xf32, #tpu.memory_space<vmem>>, vector<4x1xf32>
    %c0_8 = arith.constant 0 : index
    %c0_9 = arith.constant 0 : index
    %5 = vector.load %arg6[%c0_8, %c0_9] : memref<8x3xf32, #tpu.memory_space<vmem>>, vector<8x3xf32>
    %c0_10 = arith.constant 0 : index
    %c0_11 = arith.constant 0 : index
    %6 = vector.load %arg7[%c0_10, %c0_11] : memref<8x1xf32, #tpu.memory_space<vmem>>, vector<8x1xf32>
    %c0_12 = arith.constant 0 : index
    %c0_13 = arith.constant 0 : index
    %7 = vector.load %arg8[%c0_12, %c0_13] : memref<8x1xf32, #tpu.memory_space<vmem>>, vector<8x1xf32>
    %c0_14 = arith.constant 0 : index
    %c0_15 = arith.constant 0 : index
    %8 = vector.load %arg9[%c0_14, %c0_15] : memref<8x1xf32, #tpu.memory_space<vmem>>, vector<8x1xf32>
    %9 = tpu.iota {dimensions = array<i32: 1>} : vector<1x128xi32>
    %c96_i32 = arith.constant 96 : i32
    %10 = vector.broadcast %c96_i32 : i32 to vector<1x128xi32>
    %11 = arith.cmpi slt, %9, %10 : vector<1x128xi32>
    %cst = arith.constant 1.000000e+00 : f32
    %12 = vector.broadcast %cst : f32 to vector<128x128xf32>
    %c0_i32 = arith.constant 0 : i32
    %c1_i32 = arith.constant 1 : i32
    %13 = arith.muli %c0_i32, %c1_i32 : i32
    %c0_i32_16 = arith.constant 0 : i32
    %14 = arith.addi %c0_i32_16, %13 : i32
    %15 = arith.index_cast %14 : i32 to index
    %c0_17 = arith.constant 0 : index
    %c0_18 = arith.constant 0 : index
    %16 = vector.load %arg1[%15, %c0_17, %c0_18] : memref<4x4x128xf32, #tpu.memory_space<vmem>>, vector<1x4x128xf32>
    %17 = vector.shape_cast %16 : vector<1x4x128xf32> to vector<4x128xf32>
    %18 = vector.extract_strided_slice %1 {offsets = [0, 0], sizes = [8, 1], strides = [1, 1]} : vector<8x4xf32> to vector<8x1xf32>
    %19 = vector.extract_strided_slice %17 {offsets = [0, 0], sizes = [1, 128], strides = [1, 1]} : vector<4x128xf32> to vector<1x128xf32>
    %20 = vector.broadcast %18 : vector<8x1xf32> to vector<8x128xf32>
    %21 = vector.broadcast %19 : vector<1x128xf32> to vector<8x128xf32>
    %22 = arith.mulf %20, %21 : vector<8x128xf32>
    %23 = vector.extract_strided_slice %1 {offsets = [0, 1], sizes = [8, 1], strides = [1, 1]} : vector<8x4xf32> to vector<8x1xf32>
    %24 = vector.extract_strided_slice %17 {offsets = [1, 0], sizes = [1, 128], strides = [1, 1]} : vector<4x128xf32> to vector<1x128xf32>
    %25 = vector.broadcast %23 : vector<8x1xf32> to vector<8x128xf32>
    %26 = vector.broadcast %24 : vector<1x128xf32> to vector<8x128xf32>
    %27 = arith.mulf %25, %26 : vector<8x128xf32>
    %28 = arith.addf %22, %27 : vector<8x128xf32>
    %29 = vector.extract_strided_slice %1 {offsets = [0, 2], sizes = [8, 1], strides = [1, 1]} : vector<8x4xf32> to vector<8x1xf32>
    %30 = vector.extract_strided_slice %17 {offsets = [2, 0], sizes = [1, 128], strides = [1, 1]} : vector<4x128xf32> to vector<1x128xf32>
    %31 = vector.broadcast %29 : vector<8x1xf32> to vector<8x128xf32>
    %32 = vector.broadcast %30 : vector<1x128xf32> to vector<8x128xf32>
    %33 = arith.mulf %31, %32 : vector<8x128xf32>
    %34 = arith.addf %28, %33 : vector<8x128xf32>
    %35 = vector.extract_strided_slice %1 {offsets = [0, 3], sizes = [8, 1], strides = [1, 1]} : vector<8x4xf32> to vector<8x1xf32>
    %36 = vector.extract_strided_slice %17 {offsets = [3, 0], sizes = [1, 128], strides = [1, 1]} : vector<4x128xf32> to vector<1x128xf32>
    %37 = vector.broadcast %35 : vector<8x1xf32> to vector<8x128xf32>
    %38 = vector.broadcast %36 : vector<1x128xf32> to vector<8x128xf32>
    %39 = arith.mulf %37, %38 : vector<8x128xf32>
    %40 = arith.addf %34, %39 : vector<8x128xf32>
    %41 = vector.broadcast %2 : vector<8x1xf32> to vector<8x128xf32>
    %42 = arith.addf %40, %41 : vector<8x128xf32>
    %cst_19 = arith.constant 0.000000e+00 : f32
    %43 = vector.broadcast %cst_19 : f32 to vector<8x128xf32>
    %44 = arith.cmpf ogt, %42, %43 : vector<8x128xf32>
    %45 = vector.broadcast %0 : f32 to vector<8x128xf32>
    %46 = arith.mulf %45, %42 : vector<8x128xf32>
    %47 = arith.select %44, %42, %46 : vector<8x128xi1>, vector<8x128xf32>
    %cst_20 = arith.constant 0.000000e+00 : f32
    %48 = vector.shape_cast %11 : vector<1x128xi1> to vector<1x128xi1>
    %49 = vector.broadcast %48 : vector<1x128xi1> to vector<8x128xi1>
    %50 = vector.broadcast %cst_20 : f32 to vector<8x128xf32>
    %51 = arith.select %49, %47, %50 : vector<8x128xi1>, vector<8x128xf32>
    %cst_21 = arith.constant dense<0.000000e+00> : vector<8x128xf32>
    %52 = tpu.matmul %51, %12, %cst_21 {dimension_numbers = #tpu.dot_dimension_numbers<[1], [0], [0], [1], [0, 0, 1, 1], [], []>} : vector<8x128xf32>, vector<128x128xf32>, vector<8x128xf32> -> vector<8x128xf32>
    %53 = vector.extract_strided_slice %52 {offsets = [0, 0], sizes = [8, 1], strides = [1, 1]} : vector<8x128xf32> to vector<8x1xf32>
    %54 = vector.shape_cast %53 : vector<8x1xf32> to vector<1x8x1xf32>
    %cst_22 = arith.constant dense<0.000000e+00> : vector<1xf32>
    %55 = vector.multi_reduction <add>, %54, %cst_22 [1, 2] : vector<1x8x1xf32> to vector<1xf32>
    %56 = vector.shape_cast %55 : vector<1xf32> to vector<1x1x1xf32>
    %57 = vector.extract %56[0, 0, 0] : f32 from vector<1x1x1xf32>
    %cst_23 = arith.constant 0.00130208337 : f32
    %58 = arith.mulf %57, %cst_23 : f32
    %59 = vector.broadcast %58 : f32 to vector<8x128xf32>
    %60 = arith.subf %47, %59 : vector<8x128xf32>
    %cst_24 = arith.constant 0.000000e+00 : f32
    %61 = vector.shape_cast %11 : vector<1x128xi1> to vector<1x128xi1>
    %62 = vector.broadcast %61 : vector<1x128xi1> to vector<8x128xi1>
    %63 = vector.broadcast %cst_24 : f32 to vector<8x128xf32>
    %64 = arith.select %62, %60, %63 : vector<8x128xi1>, vector<8x128xf32>
    %65 = arith.mulf %64, %64 : vector<8x128xf32>
    %cst_25 = arith.constant dense<0.000000e+00> : vector<8x128xf32>
    %66 = tpu.matmul %65, %12, %cst_25 {dimension_numbers = #tpu.dot_dimension_numbers<[1], [0], [0], [1], [0, 0, 1, 1], [], []>} : vector<8x128xf32>, vector<128x128xf32>, vector<8x128xf32> -> vector<8x128xf32>
    %67 = vector.extract_strided_slice %66 {offsets = [0, 0], sizes = [8, 1], strides = [1, 1]} : vector<8x128xf32> to vector<8x1xf32>
    %68 = vector.shape_cast %67 : vector<8x1xf32> to vector<1x8x1xf32>
    %cst_26 = arith.constant dense<0.000000e+00> : vector<1xf32>
    %69 = vector.multi_reduction <add>, %68, %cst_26 [1, 2] : vector<1x8x1xf32> to vector<1xf32>
    %70 = vector.shape_cast %69 : vector<1xf32> to vector<1x1x1xf32>
    %71 = vector.extract %70[0, 0, 0] : f32 from vector<1x1x1xf32>
    %cst_27 = arith.constant 0.00130208337 : f32
    %72 = arith.mulf %71, %cst_27 : f32
    %cst_28 = arith.constant 9.99999974E-6 : f32
    %73 = arith.addf %72, %cst_28 : f32
    %74 = math.rsqrt %73 : f32
    %75 = vector.broadcast %74 : f32 to vector<8x128xf32>
    %76 = arith.mulf %60, %75 : vector<8x128xf32>
    %77 = vector.broadcast %7 : vector<8x1xf32> to vector<8x128xf32>
    %78 = arith.mulf %76, %77 : vector<8x128xf32>
    %79 = vector.broadcast %8 : vector<8x1xf32> to vector<8x128xf32>
    %80 = arith.addf %78, %79 : vector<8x128xf32>
    %c2_i32 = arith.constant 2 : i32
    %81 = tpu.dynamic_rotate %80 by %c2_i32 dim 1 : vector<8x128xf32>, i32 -> vector<8x128xf32>
    %c2_i32_29 = arith.constant 2 : i32
    %82 = vector.broadcast %c2_i32_29 : i32 to vector<1x128xi32>
    %83 = arith.cmpi sge, %9, %82 : vector<1x128xi32>
    %cst_30 = arith.constant 0.000000e+00 : f32
    %84 = vector.shape_cast %83 : vector<1x128xi1> to vector<1x128xi1>
    %85 = vector.broadcast %84 : vector<1x128xi1> to vector<8x128xi1>
    %86 = vector.broadcast %cst_30 : f32 to vector<8x128xf32>
    %87 = arith.select %85, %81, %86 : vector<8x128xi1>, vector<8x128xf32>
    %88 = vector.extract_strided_slice %5 {offsets = [0, 0], sizes = [8, 1], strides = [1, 1]} : vector<8x3xf32> to vector<8x1xf32>
    %89 = vector.broadcast %88 : vector<8x1xf32> to vector<8x128xf32>
    %90 = arith.mulf %89, %87 : vector<8x128xf32>
    %91 = vector.extract_strided_slice %5 {offsets = [0, 1], sizes = [8, 1], strides = [1, 1]} : vector<8x3xf32> to vector<8x1xf32>
    %92 = vector.broadcast %91 : vector<8x1xf32> to vector<8x128xf32>
    %93 = arith.mulf %92, %80 : vector<8x128xf32>
    %94 = arith.addf %90, %93 : vector<8x128xf32>
    %c126_i32 = arith.constant 126 : i32
    %95 = tpu.dynamic_rotate %80 by %c126_i32 dim 1 : vector<8x128xf32>, i32 -> vector<8x128xf32>
    %c94_i32 = arith.constant 94 : i32
    %96 = vector.broadcast %c94_i32 : i32 to vector<1x128xi32>
    %97 = arith.cmpi slt, %9, %96 : vector<1x128xi32>
    %cst_31 = arith.constant 0.000000e+00 : f32
    %98 = vector.shape_cast %97 : vector<1x128xi1> to vector<1x128xi1>
    %99 = vector.broadcast %98 : vector<1x128xi1> to vector<8x128xi1>
    %100 = vector.broadcast %cst_31 : f32 to vector<8x128xf32>
    %101 = arith.select %99, %95, %100 : vector<8x128xi1>, vector<8x128xf32>
    %102 = vector.extract_strided_slice %5 {offsets = [0, 2], sizes = [8, 1], strides = [1, 1]} : vector<8x3xf32> to vector<8x1xf32>
    %103 = vector.broadcast %102 : vector<8x1xf32> to vector<8x128xf32>
    %104 = arith.mulf %103, %101 : vector<8x128xf32>
    %105 = arith.addf %94, %104 : vector<8x128xf32>
    %106 = vector.broadcast %6 : vector<8x1xf32> to vector<8x128xf32>
    %107 = arith.addf %105, %106 : vector<8x128xf32>
    %cst_32 = arith.constant 0.000000e+00 : f32
    %108 = vector.broadcast %cst_32 : f32 to vector<8x128xf32>
    %109 = arith.cmpf ogt, %107, %108 : vector<8x128xf32>
    %110 = vector.broadcast %0 : f32 to vector<8x128xf32>
    %111 = arith.mulf %110, %107 : vector<8x128xf32>
    %112 = arith.select %109, %107, %111 : vector<8x128xi1>, vector<8x128xf32>
    %113 = vector.extract_strided_slice %3 {offsets = [0, 0], sizes = [4, 1], strides = [1, 1]} : vector<4x8xf32> to vector<4x1xf32>
    %114 = vector.extract_strided_slice %112 {offsets = [0, 0], sizes = [1, 128], strides = [1, 1]} : vector<8x128xf32> to vector<1x128xf32>
    %115 = vector.broadcast %113 : vector<4x1xf32> to vector<4x128xf32>
    %116 = vector.broadcast %114 : vector<1x128xf32> to vector<4x128xf32>
    %117 = arith.mulf %115, %116 : vector<4x128xf32>
    %118 = vector.extract_strided_slice %3 {offsets = [0, 1], sizes = [4, 1], strides = [1, 1]} : vector<4x8xf32> to vector<4x1xf32>
    %119 = vector.extract_strided_slice %112 {offsets = [1, 0], sizes = [1, 128], strides = [1, 1]} : vector<8x128xf32> to vector<1x128xf32>
    %120 = vector.broadcast %118 : vector<4x1xf32> to vector<4x128xf32>
    %121 = vector.broadcast %119 : vector<1x128xf32> to vector<4x128xf32>
    %122 = arith.mulf %120, %121 : vector<4x128xf32>
    %123 = arith.addf %117, %122 : vector<4x128xf32>
    %124 = vector.extract_strided_slice %3 {offsets = [0, 2], sizes = [4, 1], strides = [1, 1]} : vector<4x8xf32> to vector<4x1xf32>
    %125 = vector.extract_strided_slice %112 {offsets = [2, 0], sizes = [1, 128], strides = [1, 1]} : vector<8x128xf32> to vector<1x128xf32>
    %126 = vector.broadcast %124 : vector<4x1xf32> to vector<4x128xf32>
    %127 = vector.broadcast %125 : vector<1x128xf32> to vector<4x128xf32>
    %128 = arith.mulf %126, %127 : vector<4x128xf32>
    %129 = arith.addf %123, %128 : vector<4x128xf32>
    %130 = vector.extract_strided_slice %3 {offsets = [0, 3], sizes = [4, 1], strides = [1, 1]} : vector<4x8xf32> to vector<4x1xf32>
    %131 = vector.extract_strided_slice %112 {offsets = [3, 0], sizes = [1, 128], strides = [1, 1]} : vector<8x128xf32> to vector<1x128xf32>
    %132 = vector.broadcast %130 : vector<4x1xf32> to vector<4x128xf32>
    %133 = vector.broadcast %131 : vector<1x128xf32> to vector<4x128xf32>
    %134 = arith.mulf %132, %133 : vector<4x128xf32>
    %135 = arith.addf %129, %134 : vector<4x128xf32>
    %136 = vector.extract_strided_slice %3 {offsets = [0, 4], sizes = [4, 1], strides = [1, 1]} : vector<4x8xf32> to vector<4x1xf32>
    %137 = vector.extract_strided_slice %112 {offsets = [4, 0], sizes = [1, 128], strides = [1, 1]} : vector<8x128xf32> to vector<1x128xf32>
    %138 = vector.broadcast %136 : vector<4x1xf32> to vector<4x128xf32>
    %139 = vector.broadcast %137 : vector<1x128xf32> to vector<4x128xf32>
    %140 = arith.mulf %138, %139 : vector<4x128xf32>
    %141 = arith.addf %135, %140 : vector<4x128xf32>
    %142 = vector.extract_strided_slice %3 {offsets = [0, 5], sizes = [4, 1], strides = [1, 1]} : vector<4x8xf32> to vector<4x1xf32>
    %143 = vector.extract_strided_slice %112 {offsets = [5, 0], sizes = [1, 128], strides = [1, 1]} : vector<8x128xf32> to vector<1x128xf32>
    %144 = vector.broadcast %142 : vector<4x1xf32> to vector<4x128xf32>
    %145 = vector.broadcast %143 : vector<1x128xf32> to vector<4x128xf32>
    %146 = arith.mulf %144, %145 : vector<4x128xf32>
    %147 = arith.addf %141, %146 : vector<4x128xf32>
    %148 = vector.extract_strided_slice %3 {offsets = [0, 6], sizes = [4, 1], strides = [1, 1]} : vector<4x8xf32> to vector<4x1xf32>
    %149 = vector.extract_strided_slice %112 {offsets = [6, 0], sizes = [1, 128], strides = [1, 1]} : vector<8x128xf32> to vector<1x128xf32>
    %150 = vector.broadcast %148 : vector<4x1xf32> to vector<4x128xf32>
    %151 = vector.broadcast %149 : vector<1x128xf32> to vector<4x128xf32>
    %152 = arith.mulf %150, %151 : vector<4x128xf32>
    %153 = arith.addf %147, %152 : vector<4x128xf32>
    %154 = vector.extract_strided_slice %3 {offsets = [0, 7], sizes = [4, 1], strides = [1, 1]} : vector<4x8xf32> to vector<4x1xf32>
    %155 = vector.extract_strided_slice %112 {offsets = [7, 0], sizes = [1, 128], strides = [1, 1]} : vector<8x128xf32> to vector<1x128xf32>
    %156 = vector.broadcast %154 : vector<4x1xf32> to vector<4x128xf32>
    %157 = vector.broadcast %155 : vector<1x128xf32> to vector<4x128xf32>
    %158 = arith.mulf %156, %157 : vector<4x128xf32>
    %159 = arith.addf %153, %158 : vector<4x128xf32>
    %160 = vector.broadcast %4 : vector<4x1xf32> to vector<4x128xf32>
    %161 = arith.addf %159, %160 : vector<4x128xf32>
    %162 = arith.addf %17, %161 : vector<4x128xf32>
    %163 = arith.index_cast %14 : i32 to index
    %c0_33 = arith.constant 0 : index
    %c0_34 = arith.constant 0 : index
    %164 = vector.load %arg11[%163, %c0_33, %c0_34] : memref<4x4x128xf32, #tpu.memory_space<vmem>>, vector<1x4x128xf32>
    %165 = vector.shape_cast %164 : vector<1x4x128xf32> to vector<4x128xf32>
    %166 = vector.shape_cast %162 : vector<4x128xf32> to vector<1x4x128xf32>
    tpu.vector_store %arg11[%163, %c0_33, %c0_34], %166 {strides = array<i32>} : memref<4x4x128xf32, #tpu.memory_space<vmem>>, vector<1x4x128xf32>,
    %c1_i32_35 = arith.constant 1 : i32
    %c1_i32_36 = arith.constant 1 : i32
    %167 = arith.muli %c1_i32_35, %c1_i32_36 : i32
    %c0_i32_37 = arith.constant 0 : i32
    %168 = arith.addi %c0_i32_37, %167 : i32
    %169 = arith.index_cast %168 : i32 to index
    %c0_38 = arith.constant 0 : index
    %c0_39 = arith.constant 0 : index
    %170 = vector.load %arg1[%169, %c0_38, %c0_39] : memref<4x4x128xf32, #tpu.memory_space<vmem>>, vector<1x4x128xf32>
    %171 = vector.shape_cast %170 : vector<1x4x128xf32> to vector<4x128xf32>
    %172 = vector.extract_strided_slice %1 {offsets = [0, 0], sizes = [8, 1], strides = [1, 1]} : vector<8x4xf32> to vector<8x1xf32>
    %173 = vector.extract_strided_slice %171 {offsets = [0, 0], sizes = [1, 128], strides = [1, 1]} : vector<4x128xf32> to vector<1x128xf32>
    %174 = vector.broadcast %172 : vector<8x1xf32> to vector<8x128xf32>
    %175 = vector.broadcast %173 : vector<1x128xf32> to vector<8x128xf32>
    %176 = arith.mulf %174, %175 : vector<8x128xf32>
    %177 = vector.extract_strided_slice %1 {offsets = [0, 1], sizes = [8, 1], strides = [1, 1]} : vector<8x4xf32> to vector<8x1xf32>
    %178 = vector.extract_strided_slice %171 {offsets = [1, 0], sizes = [1, 128], strides = [1, 1]} : vector<4x128xf32> to vector<1x128xf32>
    %179 = vector.broadcast %177 : vector<8x1xf32> to vector<8x128xf32>
    %180 = vector.broadcast %178 : vector<1x128xf32> to vector<8x128xf32>
    %181 = arith.mulf %179, %180 : vector<8x128xf32>
    %182 = arith.addf %176, %181 : vector<8x128xf32>
    %183 = vector.extract_strided_slice %1 {offsets = [0, 2], sizes = [8, 1], strides = [1, 1]} : vector<8x4xf32> to vector<8x1xf32>
    %184 = vector.extract_strided_slice %171 {offsets = [2, 0], sizes = [1, 128], strides = [1, 1]} : vector<4x128xf32> to vector<1x128xf32>
    %185 = vector.broadcast %183 : vector<8x1xf32> to vector<8x128xf32>
    %186 = vector.broadcast %184 : vector<1x128xf32> to vector<8x128xf32>
    %187 = arith.mulf %185, %186 : vector<8x128xf32>
    %188 = arith.addf %182, %187 : vector<8x128xf32>
    %189 = vector.extract_strided_slice %1 {offsets = [0, 3], sizes = [8, 1], strides = [1, 1]} : vector<8x4xf32> to vector<8x1xf32>
    %190 = vector.extract_strided_slice %171 {offsets = [3, 0], sizes = [1, 128], strides = [1, 1]} : vector<4x128xf32> to vector<1x128xf32>
    %191 = vector.broadcast %189 : vector<8x1xf32> to vector<8x128xf32>
    %192 = vector.broadcast %190 : vector<1x128xf32> to vector<8x128xf32>
    %193 = arith.mulf %191, %192 : vector<8x128xf32>
    %194 = arith.addf %188, %193 : vector<8x128xf32>
    %195 = vector.broadcast %2 : vector<8x1xf32> to vector<8x128xf32>
    %196 = arith.addf %194, %195 : vector<8x128xf32>
    %cst_40 = arith.constant 0.000000e+00 : f32
    %197 = vector.broadcast %cst_40 : f32 to vector<8x128xf32>
    %198 = arith.cmpf ogt, %196, %197 : vector<8x128xf32>
    %199 = vector.broadcast %0 : f32 to vector<8x128xf32>
    %200 = arith.mulf %199, %196 : vector<8x128xf32>
    %201 = arith.select %198, %196, %200 : vector<8x128xi1>, vector<8x128xf32>
    %cst_41 = arith.constant 0.000000e+00 : f32
    %202 = vector.shape_cast %11 : vector<1x128xi1> to vector<1x128xi1>
    %203 = vector.broadcast %202 : vector<1x128xi1> to vector<8x128xi1>
    %204 = vector.broadcast %cst_41 : f32 to vector<8x128xf32>
    %205 = arith.select %203, %201, %204 : vector<8x128xi1>, vector<8x128xf32>
    %cst_42 = arith.constant dense<0.000000e+00> : vector<8x128xf32>
    %206 = tpu.matmul %205, %12, %cst_42 {dimension_numbers = #tpu.dot_dimension_numbers<[1], [0], [0], [1], [0, 0, 1, 1], [], []>} : vector<8x128xf32>, vector<128x128xf32>, vector<8x128xf32> -> vector<8x128xf32>
    %207 = vector.extract_strided_slice %206 {offsets = [0, 0], sizes = [8, 1], strides = [1, 1]} : vector<8x128xf32> to vector<8x1xf32>
    %208 = vector.shape_cast %207 : vector<8x1xf32> to vector<1x8x1xf32>
    %cst_43 = arith.constant dense<0.000000e+00> : vector<1xf32>
    %209 = vector.multi_reduction <add>, %208, %cst_43 [1, 2] : vector<1x8x1xf32> to vector<1xf32>
    %210 = vector.shape_cast %209 : vector<1xf32> to vector<1x1x1xf32>
    %211 = vector.extract %210[0, 0, 0] : f32 from vector<1x1x1xf32>
    %cst_44 = arith.constant 0.00130208337 : f32
    %212 = arith.mulf %211, %cst_44 : f32
    %213 = vector.broadcast %212 : f32 to vector<8x128xf32>
    %214 = arith.subf %201, %213 : vector<8x128xf32>
    %cst_45 = arith.constant 0.000000e+00 : f32
    %215 = vector.shape_cast %11 : vector<1x128xi1> to vector<1x128xi1>
    %216 = vector.broadcast %215 : vector<1x128xi1> to vector<8x128xi1>
    %217 = vector.broadcast %cst_45 : f32 to vector<8x128xf32>
    %218 = arith.select %216, %214, %217 : vector<8x128xi1>, vector<8x128xf32>
    %219 = arith.mulf %218, %218 : vector<8x128xf32>
    %cst_46 = arith.constant dense<0.000000e+00> : vector<8x128xf32>
    %220 = tpu.matmul %219, %12, %cst_46 {dimension_numbers = #tpu.dot_dimension_numbers<[1], [0], [0], [1], [0, 0, 1, 1], [], []>} : vector<8x128xf32>, vector<128x128xf32>, vector<8x128xf32> -> vector<8x128xf32>
    %221 = vector.extract_strided_slice %220 {offsets = [0, 0], sizes = [8, 1], strides = [1, 1]} : vector<8x128xf32> to vector<8x1xf32>
    %222 = vector.shape_cast %221 : vector<8x1xf32> to vector<1x8x1xf32>
    %cst_47 = arith.constant dense<0.000000e+00> : vector<1xf32>
    %223 = vector.multi_reduction <add>, %222, %cst_47 [1, 2] : vector<1x8x1xf32> to vector<1xf32>
    %224 = vector.shape_cast %223 : vector<1xf32> to vector<1x1x1xf32>
    %225 = vector.extract %224[0, 0, 0] : f32 from vector<1x1x1xf32>
    %cst_48 = arith.constant 0.00130208337 : f32
    %226 = arith.mulf %225, %cst_48 : f32
    %cst_49 = arith.constant 9.99999974E-6 : f32
    %227 = arith.addf %226, %cst_49 : f32
    %228 = math.rsqrt %227 : f32
    %229 = vector.broadcast %228 : f32 to vector<8x128xf32>
    %230 = arith.mulf %214, %229 : vector<8x128xf32>
    %231 = vector.broadcast %7 : vector<8x1xf32> to vector<8x128xf32>
    %232 = arith.mulf %230, %231 : vector<8x128xf32>
    %233 = vector.broadcast %8 : vector<8x1xf32> to vector<8x128xf32>
    %234 = arith.addf %232, %233 : vector<8x128xf32>
    %c2_i32_50 = arith.constant 2 : i32
    %235 = tpu.dynamic_rotate %234 by %c2_i32_50 dim 1 : vector<8x128xf32>, i32 -> vector<8x128xf32>
    %c2_i32_51 = arith.constant 2 : i32
    %236 = vector.broadcast %c2_i32_51 : i32 to vector<1x128xi32>
    %237 = arith.cmpi sge, %9, %236 : vector<1x128xi32>
    %cst_52 = arith.constant 0.000000e+00 : f32
    %238 = vector.shape_cast %237 : vector<1x128xi1> to vector<1x128xi1>
    %239 = vector.broadcast %238 : vector<1x128xi1> to vector<8x128xi1>
    %240 = vector.broadcast %cst_52 : f32 to vector<8x128xf32>
    %241 = arith.select %239, %235, %240 : vector<8x128xi1>, vector<8x128xf32>
    %242 = vector.extract_strided_slice %5 {offsets = [0, 0], sizes = [8, 1], strides = [1, 1]} : vector<8x3xf32> to vector<8x1xf32>
    %243 = vector.broadcast %242 : vector<8x1xf32> to vector<8x128xf32>
    %244 = arith.mulf %243, %241 : vector<8x128xf32>
    %245 = vector.extract_strided_slice %5 {offsets = [0, 1], sizes = [8, 1], strides = [1, 1]} : vector<8x3xf32> to vector<8x1xf32>
    %246 = vector.broadcast %245 : vector<8x1xf32> to vector<8x128xf32>
    %247 = arith.mulf %246, %234 : vector<8x128xf32>
    %248 = arith.addf %244, %247 : vector<8x128xf32>
    %c126_i32_53 = arith.constant 126 : i32
    %249 = tpu.dynamic_rotate %234 by %c126_i32_53 dim 1 : vector<8x128xf32>, i32 -> vector<8x128xf32>
    %c94_i32_54 = arith.constant 94 : i32
    %250 = vector.broadcast %c94_i32_54 : i32 to vector<1x128xi32>
    %251 = arith.cmpi slt, %9, %250 : vector<1x128xi32>
    %cst_55 = arith.constant 0.000000e+00 : f32
    %252 = vector.shape_cast %251 : vector<1x128xi1> to vector<1x128xi1>
    %253 = vector.broadcast %252 : vector<1x128xi1> to vector<8x128xi1>
    %254 = vector.broadcast %cst_55 : f32 to vector<8x128xf32>
    %255 = arith.select %253, %249, %254 : vector<8x128xi1>, vector<8x128xf32>
    %256 = vector.extract_strided_slice %5 {offsets = [0, 2], sizes = [8, 1], strides = [1, 1]} : vector<8x3xf32> to vector<8x1xf32>
    %257 = vector.broadcast %256 : vector<8x1xf32> to vector<8x128xf32>
    %258 = arith.mulf %257, %255 : vector<8x128xf32>
    %259 = arith.addf %248, %258 : vector<8x128xf32>
    %260 = vector.broadcast %6 : vector<8x1xf32> to vector<8x128xf32>
    %261 = arith.addf %259, %260 : vector<8x128xf32>
    %cst_56 = arith.constant 0.000000e+00 : f32
    %262 = vector.broadcast %cst_56 : f32 to vector<8x128xf32>
    %263 = arith.cmpf ogt, %261, %262 : vector<8x128xf32>
    %264 = vector.broadcast %0 : f32 to vector<8x128xf32>
    %265 = arith.mulf %264, %261 : vector<8x128xf32>
    %266 = arith.select %263, %261, %265 : vector<8x128xi1>, vector<8x128xf32>
    %267 = vector.extract_strided_slice %3 {offsets = [0, 0], sizes = [4, 1], strides = [1, 1]} : vector<4x8xf32> to vector<4x1xf32>
    %268 = vector.extract_strided_slice %266 {offsets = [0, 0], sizes = [1, 128], strides = [1, 1]} : vector<8x128xf32> to vector<1x128xf32>
    %269 = vector.broadcast %267 : vector<4x1xf32> to vector<4x128xf32>
    %270 = vector.broadcast %268 : vector<1x128xf32> to vector<4x128xf32>
    %271 = arith.mulf %269, %270 : vector<4x128xf32>
    %272 = vector.extract_strided_slice %3 {offsets = [0, 1], sizes = [4, 1], strides = [1, 1]} : vector<4x8xf32> to vector<4x1xf32>
    %273 = vector.extract_strided_slice %266 {offsets = [1, 0], sizes = [1, 128], strides = [1, 1]} : vector<8x128xf32> to vector<1x128xf32>
    %274 = vector.broadcast %272 : vector<4x1xf32> to vector<4x128xf32>
    %275 = vector.broadcast %273 : vector<1x128xf32> to vector<4x128xf32>
    %276 = arith.mulf %274, %275 : vector<4x128xf32>
    %277 = arith.addf %271, %276 : vector<4x128xf32>
    %278 = vector.extract_strided_slice %3 {offsets = [0, 2], sizes = [4, 1], strides = [1, 1]} : vector<4x8xf32> to vector<4x1xf32>
    %279 = vector.extract_strided_slice %266 {offsets = [2, 0], sizes = [1, 128], strides = [1, 1]} : vector<8x128xf32> to vector<1x128xf32>
    %280 = vector.broadcast %278 : vector<4x1xf32> to vector<4x128xf32>
    %281 = vector.broadcast %279 : vector<1x128xf32> to vector<4x128xf32>
    %282 = arith.mulf %280, %281 : vector<4x128xf32>
    %283 = arith.addf %277, %282 : vector<4x128xf32>
    %284 = vector.extract_strided_slice %3 {offsets = [0, 3], sizes = [4, 1], strides = [1, 1]} : vector<4x8xf32> to vector<4x1xf32>
    %285 = vector.extract_strided_slice %266 {offsets = [3, 0], sizes = [1, 128], strides = [1, 1]} : vector<8x128xf32> to vector<1x128xf32>
    %286 = vector.broadcast %284 : vector<4x1xf32> to vector<4x128xf32>
    %287 = vector.broadcast %285 : vector<1x128xf32> to vector<4x128xf32>
    %288 = arith.mulf %286, %287 : vector<4x128xf32>
    %289 = arith.addf %283, %288 : vector<4x128xf32>
    %290 = vector.extract_strided_slice %3 {offsets = [0, 4], sizes = [4, 1], strides = [1, 1]} : vector<4x8xf32> to vector<4x1xf32>
    %291 = vector.extract_strided_slice %266 {offsets = [4, 0], sizes = [1, 128], strides = [1, 1]} : vector<8x128xf32> to vector<1x128xf32>
    %292 = vector.broadcast %290 : vector<4x1xf32> to vector<4x128xf32>
    %293 = vector.broadcast %291 : vector<1x128xf32> to vector<4x128xf32>
    %294 = arith.mulf %292, %293 : vector<4x128xf32>
    %295 = arith.addf %289, %294 : vector<4x128xf32>
    %296 = vector.extract_strided_slice %3 {offsets = [0, 5], sizes = [4, 1], strides = [1, 1]} : vector<4x8xf32> to vector<4x1xf32>
    %297 = vector.extract_strided_slice %266 {offsets = [5, 0], sizes = [1, 128], strides = [1, 1]} : vector<8x128xf32> to vector<1x128xf32>
    %298 = vector.broadcast %296 : vector<4x1xf32> to vector<4x128xf32>
    %299 = vector.broadcast %297 : vector<1x128xf32> to vector<4x128xf32>
    %300 = arith.mulf %298, %299 : vector<4x128xf32>
    %301 = arith.addf %295, %300 : vector<4x128xf32>
    %302 = vector.extract_strided_slice %3 {offsets = [0, 6], sizes = [4, 1], strides = [1, 1]} : vector<4x8xf32> to vector<4x1xf32>
    %303 = vector.extract_strided_slice %266 {offsets = [6, 0], sizes = [1, 128], strides = [1, 1]} : vector<8x128xf32> to vector<1x128xf32>
    %304 = vector.broadcast %302 : vector<4x1xf32> to vector<4x128xf32>
    %305 = vector.broadcast %303 : vector<1x128xf32> to vector<4x128xf32>
    %306 = arith.mulf %304, %305 : vector<4x128xf32>
    %307 = arith.addf %301, %306 : vector<4x128xf32>
    %308 = vector.extract_strided_slice %3 {offsets = [0, 7], sizes = [4, 1], strides = [1, 1]} : vector<4x8xf32> to vector<4x1xf32>
    %309 = vector.extract_strided_slice %266 {offsets = [7, 0], sizes = [1, 128], strides = [1, 1]} : vector<8x128xf32> to vector<1x128xf32>
    %310 = vector.broadcast %308 : vector<4x1xf32> to vector<4x128xf32>
    %311 = vector.broadcast %309 : vector<1x128xf32> to vector<4x128xf32>
    %312 = arith.mulf %310, %311 : vector<4x128xf32>
    %313 = arith.addf %307, %312 : vector<4x128xf32>
    %314 = vector.broadcast %4 : vector<4x1xf32> to vector<4x128xf32>
    %315 = arith.addf %313, %314 : vector<4x128xf32>
    %316 = arith.addf %171, %315 : vector<4x128xf32>
    %317 = arith.index_cast %168 : i32 to index
    %c0_57 = arith.constant 0 : index
    %c0_58 = arith.constant 0 : index
    %318 = vector.load %arg11[%317, %c0_57, %c0_58] : memref<4x4x128xf32, #tpu.memory_space<vmem>>, vector<1x4x128xf32>
    %319 = vector.shape_cast %318 : vector<1x4x128xf32> to vector<4x128xf32>
    %320 = vector.shape_cast %316 : vector<4x128xf32> to vector<1x4x128xf32>
    tpu.vector_store %arg11[%317, %c0_57, %c0_58], %320 {strides = array<i32>} : memref<4x4x128xf32, #tpu.memory_space<vmem>>, vector<1x4x128xf32>,
    %c2_i32_59 = arith.constant 2 : i32
    %c1_i32_60 = arith.constant 1 : i32
    %321 = arith.muli %c2_i32_59, %c1_i32_60 : i32
    %c0_i32_61 = arith.constant 0 : i32
    %322 = arith.addi %c0_i32_61, %321 : i32
    %323 = arith.index_cast %322 : i32 to index
    %c0_62 = arith.constant 0 : index
    %c0_63 = arith.constant 0 : index
    %324 = vector.load %arg1[%323, %c0_62, %c0_63] : memref<4x4x128xf32, #tpu.memory_space<vmem>>, vector<1x4x128xf32>
    %325 = vector.shape_cast %324 : vector<1x4x128xf32> to vector<4x128xf32>
    %326 = vector.extract_strided_slice %1 {offsets = [0, 0], sizes = [8, 1], strides = [1, 1]} : vector<8x4xf32> to vector<8x1xf32>
    %327 = vector.extract_strided_slice %325 {offsets = [0, 0], sizes = [1, 128], strides = [1, 1]} : vector<4x128xf32> to vector<1x128xf32>
    %328 = vector.broadcast %326 : vector<8x1xf32> to vector<8x128xf32>
    %329 = vector.broadcast %327 : vector<1x128xf32> to vector<8x128xf32>
    %330 = arith.mulf %328, %329 : vector<8x128xf32>
    %331 = vector.extract_strided_slice %1 {offsets = [0, 1], sizes = [8, 1], strides = [1, 1]} : vector<8x4xf32> to vector<8x1xf32>
    %332 = vector.extract_strided_slice %325 {offsets = [1, 0], sizes = [1, 128], strides = [1, 1]} : vector<4x128xf32> to vector<1x128xf32>
    %333 = vector.broadcast %331 : vector<8x1xf32> to vector<8x128xf32>
    %334 = vector.broadcast %332 : vector<1x128xf32> to vector<8x128xf32>
    %335 = arith.mulf %333, %334 : vector<8x128xf32>
    %336 = arith.addf %330, %335 : vector<8x128xf32>
    %337 = vector.extract_strided_slice %1 {offsets = [0, 2], sizes = [8, 1], strides = [1, 1]} : vector<8x4xf32> to vector<8x1xf32>
    %338 = vector.extract_strided_slice %325 {offsets = [2, 0], sizes = [1, 128], strides = [1, 1]} : vector<4x128xf32> to vector<1x128xf32>
    %339 = vector.broadcast %337 : vector<8x1xf32> to vector<8x128xf32>
    %340 = vector.broadcast %338 : vector<1x128xf32> to vector<8x128xf32>
    %341 = arith.mulf %339, %340 : vector<8x128xf32>
    %342 = arith.addf %336, %341 : vector<8x128xf32>
    %343 = vector.extract_strided_slice %1 {offsets = [0, 3], sizes = [8, 1], strides = [1, 1]} : vector<8x4xf32> to vector<8x1xf32>
    %344 = vector.extract_strided_slice %325 {offsets = [3, 0], sizes = [1, 128], strides = [1, 1]} : vector<4x128xf32> to vector<1x128xf32>
    %345 = vector.broadcast %343 : vector<8x1xf32> to vector<8x128xf32>
    %346 = vector.broadcast %344 : vector<1x128xf32> to vector<8x128xf32>
    %347 = arith.mulf %345, %346 : vector<8x128xf32>
    %348 = arith.addf %342, %347 : vector<8x128xf32>
    %349 = vector.broadcast %2 : vector<8x1xf32> to vector<8x128xf32>
    %350 = arith.addf %348, %349 : vector<8x128xf32>
    %cst_64 = arith.constant 0.000000e+00 : f32
    %351 = vector.broadcast %cst_64 : f32 to vector<8x128xf32>
    %352 = arith.cmpf ogt, %350, %351 : vector<8x128xf32>
    %353 = vector.broadcast %0 : f32 to vector<8x128xf32>
    %354 = arith.mulf %353, %350 : vector<8x128xf32>
    %355 = arith.select %352, %350, %354 : vector<8x128xi1>, vector<8x128xf32>
    %cst_65 = arith.constant 0.000000e+00 : f32
    %356 = vector.shape_cast %11 : vector<1x128xi1> to vector<1x128xi1>
    %357 = vector.broadcast %356 : vector<1x128xi1> to vector<8x128xi1>
    %358 = vector.broadcast %cst_65 : f32 to vector<8x128xf32>
    %359 = arith.select %357, %355, %358 : vector<8x128xi1>, vector<8x128xf32>
    %cst_66 = arith.constant dense<0.000000e+00> : vector<8x128xf32>
    %360 = tpu.matmul %359, %12, %cst_66 {dimension_numbers = #tpu.dot_dimension_numbers<[1], [0], [0], [1], [0, 0, 1, 1], [], []>} : vector<8x128xf32>, vector<128x128xf32>, vector<8x128xf32> -> vector<8x128xf32>
    %361 = vector.extract_strided_slice %360 {offsets = [0, 0], sizes = [8, 1], strides = [1, 1]} : vector<8x128xf32> to vector<8x1xf32>
    %362 = vector.shape_cast %361 : vector<8x1xf32> to vector<1x8x1xf32>
    %cst_67 = arith.constant dense<0.000000e+00> : vector<1xf32>
    %363 = vector.multi_reduction <add>, %362, %cst_67 [1, 2] : vector<1x8x1xf32> to vector<1xf32>
    %364 = vector.shape_cast %363 : vector<1xf32> to vector<1x1x1xf32>
    %365 = vector.extract %364[0, 0, 0] : f32 from vector<1x1x1xf32>
    %cst_68 = arith.constant 0.00130208337 : f32
    %366 = arith.mulf %365, %cst_68 : f32
    %367 = vector.broadcast %366 : f32 to vector<8x128xf32>
    %368 = arith.subf %355, %367 : vector<8x128xf32>
    %cst_69 = arith.constant 0.000000e+00 : f32
    %369 = vector.shape_cast %11 : vector<1x128xi1> to vector<1x128xi1>
    %370 = vector.broadcast %369 : vector<1x128xi1> to vector<8x128xi1>
    %371 = vector.broadcast %cst_69 : f32 to vector<8x128xf32>
    %372 = arith.select %370, %368, %371 : vector<8x128xi1>, vector<8x128xf32>
    %373 = arith.mulf %372, %372 : vector<8x128xf32>
    %cst_70 = arith.constant dense<0.000000e+00> : vector<8x128xf32>
    %374 = tpu.matmul %373, %12, %cst_70 {dimension_numbers = #tpu.dot_dimension_numbers<[1], [0], [0], [1], [0, 0, 1, 1], [], []>} : vector<8x128xf32>, vector<128x128xf32>, vector<8x128xf32> -> vector<8x128xf32>
    %375 = vector.extract_strided_slice %374 {offsets = [0, 0], sizes = [8, 1], strides = [1, 1]} : vector<8x128xf32> to vector<8x1xf32>
    %376 = vector.shape_cast %375 : vector<8x1xf32> to vector<1x8x1xf32>
    %cst_71 = arith.constant dense<0.000000e+00> : vector<1xf32>
    %377 = vector.multi_reduction <add>, %376, %cst_71 [1, 2] : vector<1x8x1xf32> to vector<1xf32>
    %378 = vector.shape_cast %377 : vector<1xf32> to vector<1x1x1xf32>
    %379 = vector.extract %378[0, 0, 0] : f32 from vector<1x1x1xf32>
    %cst_72 = arith.constant 0.00130208337 : f32
    %380 = arith.mulf %379, %cst_72 : f32
    %cst_73 = arith.constant 9.99999974E-6 : f32
    %381 = arith.addf %380, %cst_73 : f32
    %382 = math.rsqrt %381 : f32
    %383 = vector.broadcast %382 : f32 to vector<8x128xf32>
    %384 = arith.mulf %368, %383 : vector<8x128xf32>
    %385 = vector.broadcast %7 : vector<8x1xf32> to vector<8x128xf32>
    %386 = arith.mulf %384, %385 : vector<8x128xf32>
    %387 = vector.broadcast %8 : vector<8x1xf32> to vector<8x128xf32>
    %388 = arith.addf %386, %387 : vector<8x128xf32>
    %c2_i32_74 = arith.constant 2 : i32
    %389 = tpu.dynamic_rotate %388 by %c2_i32_74 dim 1 : vector<8x128xf32>, i32 -> vector<8x128xf32>
    %c2_i32_75 = arith.constant 2 : i32
    %390 = vector.broadcast %c2_i32_75 : i32 to vector<1x128xi32>
    %391 = arith.cmpi sge, %9, %390 : vector<1x128xi32>
    %cst_76 = arith.constant 0.000000e+00 : f32
    %392 = vector.shape_cast %391 : vector<1x128xi1> to vector<1x128xi1>
    %393 = vector.broadcast %392 : vector<1x128xi1> to vector<8x128xi1>
    %394 = vector.broadcast %cst_76 : f32 to vector<8x128xf32>
    %395 = arith.select %393, %389, %394 : vector<8x128xi1>, vector<8x128xf32>
    %396 = vector.extract_strided_slice %5 {offsets = [0, 0], sizes = [8, 1], strides = [1, 1]} : vector<8x3xf32> to vector<8x1xf32>
    %397 = vector.broadcast %396 : vector<8x1xf32> to vector<8x128xf32>
    %398 = arith.mulf %397, %395 : vector<8x128xf32>
    %399 = vector.extract_strided_slice %5 {offsets = [0, 1], sizes = [8, 1], strides = [1, 1]} : vector<8x3xf32> to vector<8x1xf32>
    %400 = vector.broadcast %399 : vector<8x1xf32> to vector<8x128xf32>
    %401 = arith.mulf %400, %388 : vector<8x128xf32>
    %402 = arith.addf %398, %401 : vector<8x128xf32>
    %c126_i32_77 = arith.constant 126 : i32
    %403 = tpu.dynamic_rotate %388 by %c126_i32_77 dim 1 : vector<8x128xf32>, i32 -> vector<8x128xf32>
    %c94_i32_78 = arith.constant 94 : i32
    %404 = vector.broadcast %c94_i32_78 : i32 to vector<1x128xi32>
    %405 = arith.cmpi slt, %9, %404 : vector<1x128xi32>
    %cst_79 = arith.constant 0.000000e+00 : f32
    %406 = vector.shape_cast %405 : vector<1x128xi1> to vector<1x128xi1>
    %407 = vector.broadcast %406 : vector<1x128xi1> to vector<8x128xi1>
    %408 = vector.broadcast %cst_79 : f32 to vector<8x128xf32>
    %409 = arith.select %407, %403, %408 : vector<8x128xi1>, vector<8x128xf32>
    %410 = vector.extract_strided_slice %5 {offsets = [0, 2], sizes = [8, 1], strides = [1, 1]} : vector<8x3xf32> to vector<8x1xf32>
    %411 = vector.broadcast %410 : vector<8x1xf32> to vector<8x128xf32>
    %412 = arith.mulf %411, %409 : vector<8x128xf32>
    %413 = arith.addf %402, %412 : vector<8x128xf32>
    %414 = vector.broadcast %6 : vector<8x1xf32> to vector<8x128xf32>
    %415 = arith.addf %413, %414 : vector<8x128xf32>
    %cst_80 = arith.constant 0.000000e+00 : f32
    %416 = vector.broadcast %cst_80 : f32 to vector<8x128xf32>
    %417 = arith.cmpf ogt, %415, %416 : vector<8x128xf32>
    %418 = vector.broadcast %0 : f32 to vector<8x128xf32>
    %419 = arith.mulf %418, %415 : vector<8x128xf32>
    %420 = arith.select %417, %415, %419 : vector<8x128xi1>, vector<8x128xf32>
    %421 = vector.extract_strided_slice %3 {offsets = [0, 0], sizes = [4, 1], strides = [1, 1]} : vector<4x8xf32> to vector<4x1xf32>
    %422 = vector.extract_strided_slice %420 {offsets = [0, 0], sizes = [1, 128], strides = [1, 1]} : vector<8x128xf32> to vector<1x128xf32>
    %423 = vector.broadcast %421 : vector<4x1xf32> to vector<4x128xf32>
    %424 = vector.broadcast %422 : vector<1x128xf32> to vector<4x128xf32>
    %425 = arith.mulf %423, %424 : vector<4x128xf32>
    %426 = vector.extract_strided_slice %3 {offsets = [0, 1], sizes = [4, 1], strides = [1, 1]} : vector<4x8xf32> to vector<4x1xf32>
    %427 = vector.extract_strided_slice %420 {offsets = [1, 0], sizes = [1, 128], strides = [1, 1]} : vector<8x128xf32> to vector<1x128xf32>
    %428 = vector.broadcast %426 : vector<4x1xf32> to vector<4x128xf32>
    %429 = vector.broadcast %427 : vector<1x128xf32> to vector<4x128xf32>
    %430 = arith.mulf %428, %429 : vector<4x128xf32>
    %431 = arith.addf %425, %430 : vector<4x128xf32>
    %432 = vector.extract_strided_slice %3 {offsets = [0, 2], sizes = [4, 1], strides = [1, 1]} : vector<4x8xf32> to vector<4x1xf32>
    %433 = vector.extract_strided_slice %420 {offsets = [2, 0], sizes = [1, 128], strides = [1, 1]} : vector<8x128xf32> to vector<1x128xf32>
    %434 = vector.broadcast %432 : vector<4x1xf32> to vector<4x128xf32>
    %435 = vector.broadcast %433 : vector<1x128xf32> to vector<4x128xf32>
    %436 = arith.mulf %434, %435 : vector<4x128xf32>
    %437 = arith.addf %431, %436 : vector<4x128xf32>
    %438 = vector.extract_strided_slice %3 {offsets = [0, 3], sizes = [4, 1], strides = [1, 1]} : vector<4x8xf32> to vector<4x1xf32>
    %439 = vector.extract_strided_slice %420 {offsets = [3, 0], sizes = [1, 128], strides = [1, 1]} : vector<8x128xf32> to vector<1x128xf32>
    %440 = vector.broadcast %438 : vector<4x1xf32> to vector<4x128xf32>
    %441 = vector.broadcast %439 : vector<1x128xf32> to vector<4x128xf32>
    %442 = arith.mulf %440, %441 : vector<4x128xf32>
    %443 = arith.addf %437, %442 : vector<4x128xf32>
    %444 = vector.extract_strided_slice %3 {offsets = [0, 4], sizes = [4, 1], strides = [1, 1]} : vector<4x8xf32> to vector<4x1xf32>
    %445 = vector.extract_strided_slice %420 {offsets = [4, 0], sizes = [1, 128], strides = [1, 1]} : vector<8x128xf32> to vector<1x128xf32>
    %446 = vector.broadcast %444 : vector<4x1xf32> to vector<4x128xf32>
    %447 = vector.broadcast %445 : vector<1x128xf32> to vector<4x128xf32>
    %448 = arith.mulf %446, %447 : vector<4x128xf32>
    %449 = arith.addf %443, %448 : vector<4x128xf32>
    %450 = vector.extract_strided_slice %3 {offsets = [0, 5], sizes = [4, 1], strides = [1, 1]} : vector<4x8xf32> to vector<4x1xf32>
    %451 = vector.extract_strided_slice %420 {offsets = [5, 0], sizes = [1, 128], strides = [1, 1]} : vector<8x128xf32> to vector<1x128xf32>
    %452 = vector.broadcast %450 : vector<4x1xf32> to vector<4x128xf32>
    %453 = vector.broadcast %451 : vector<1x128xf32> to vector<4x128xf32>
    %454 = arith.mulf %452, %453 : vector<4x128xf32>
    %455 = arith.addf %449, %454 : vector<4x128xf32>
    %456 = vector.extract_strided_slice %3 {offsets = [0, 6], sizes = [4, 1], strides = [1, 1]} : vector<4x8xf32> to vector<4x1xf32>
    %457 = vector.extract_strided_slice %420 {offsets = [6, 0], sizes = [1, 128], strides = [1, 1]} : vector<8x128xf32> to vector<1x128xf32>
    %458 = vector.broadcast %456 : vector<4x1xf32> to vector<4x128xf32>
    %459 = vector.broadcast %457 : vector<1x128xf32> to vector<4x128xf32>
    %460 = arith.mulf %458, %459 : vector<4x128xf32>
    %461 = arith.addf %455, %460 : vector<4x128xf32>
    %462 = vector.extract_strided_slice %3 {offsets = [0, 7], sizes = [4, 1], strides = [1, 1]} : vector<4x8xf32> to vector<4x1xf32>
    %463 = vector.extract_strided_slice %420 {offsets = [7, 0], sizes = [1, 128], strides = [1, 1]} : vector<8x128xf32> to vector<1x128xf32>
    %464 = vector.broadcast %462 : vector<4x1xf32> to vector<4x128xf32>
    %465 = vector.broadcast %463 : vector<1x128xf32> to vector<4x128xf32>
    %466 = arith.mulf %464, %465 : vector<4x128xf32>
    %467 = arith.addf %461, %466 : vector<4x128xf32>
    %468 = vector.broadcast %4 : vector<4x1xf32> to vector<4x128xf32>
    %469 = arith.addf %467, %468 : vector<4x128xf32>
    %470 = arith.addf %325, %469 : vector<4x128xf32>
    %471 = arith.index_cast %322 : i32 to index
    %c0_81 = arith.constant 0 : index
    %c0_82 = arith.constant 0 : index
    %472 = vector.load %arg11[%471, %c0_81, %c0_82] : memref<4x4x128xf32, #tpu.memory_space<vmem>>, vector<1x4x128xf32>
    %473 = vector.shape_cast %472 : vector<1x4x128xf32> to vector<4x128xf32>
    %474 = vector.shape_cast %470 : vector<4x128xf32> to vector<1x4x128xf32>
    tpu.vector_store %arg11[%471, %c0_81, %c0_82], %474 {strides = array<i32>} : memref<4x4x128xf32, #tpu.memory_space<vmem>>, vector<1x4x128xf32>,
    %c3_i32 = arith.constant 3 : i32
    %c1_i32_83 = arith.constant 1 : i32
    %475 = arith.muli %c3_i32, %c1_i32_83 : i32
    %c0_i32_84 = arith.constant 0 : i32
    %476 = arith.addi %c0_i32_84, %475 : i32
    %477 = arith.index_cast %476 : i32 to index
    %c0_85 = arith.constant 0 : index
    %c0_86 = arith.constant 0 : index
    %478 = vector.load %arg1[%477, %c0_85, %c0_86] : memref<4x4x128xf32, #tpu.memory_space<vmem>>, vector<1x4x128xf32>
    %479 = vector.shape_cast %478 : vector<1x4x128xf32> to vector<4x128xf32>
    %480 = vector.extract_strided_slice %1 {offsets = [0, 0], sizes = [8, 1], strides = [1, 1]} : vector<8x4xf32> to vector<8x1xf32>
    %481 = vector.extract_strided_slice %479 {offsets = [0, 0], sizes = [1, 128], strides = [1, 1]} : vector<4x128xf32> to vector<1x128xf32>
    %482 = vector.broadcast %480 : vector<8x1xf32> to vector<8x128xf32>
    %483 = vector.broadcast %481 : vector<1x128xf32> to vector<8x128xf32>
    %484 = arith.mulf %482, %483 : vector<8x128xf32>
    %485 = vector.extract_strided_slice %1 {offsets = [0, 1], sizes = [8, 1], strides = [1, 1]} : vector<8x4xf32> to vector<8x1xf32>
    %486 = vector.extract_strided_slice %479 {offsets = [1, 0], sizes = [1, 128], strides = [1, 1]} : vector<4x128xf32> to vector<1x128xf32>
    %487 = vector.broadcast %485 : vector<8x1xf32> to vector<8x128xf32>
    %488 = vector.broadcast %486 : vector<1x128xf32> to vector<8x128xf32>
    %489 = arith.mulf %487, %488 : vector<8x128xf32>
    %490 = arith.addf %484, %489 : vector<8x128xf32>
    %491 = vector.extract_strided_slice %1 {offsets = [0, 2], sizes = [8, 1], strides = [1, 1]} : vector<8x4xf32> to vector<8x1xf32>
    %492 = vector.extract_strided_slice %479 {offsets = [2, 0], sizes = [1, 128], strides = [1, 1]} : vector<4x128xf32> to vector<1x128xf32>
    %493 = vector.broadcast %491 : vector<8x1xf32> to vector<8x128xf32>
    %494 = vector.broadcast %492 : vector<1x128xf32> to vector<8x128xf32>
    %495 = arith.mulf %493, %494 : vector<8x128xf32>
    %496 = arith.addf %490, %495 : vector<8x128xf32>
    %497 = vector.extract_strided_slice %1 {offsets = [0, 3], sizes = [8, 1], strides = [1, 1]} : vector<8x4xf32> to vector<8x1xf32>
    %498 = vector.extract_strided_slice %479 {offsets = [3, 0], sizes = [1, 128], strides = [1, 1]} : vector<4x128xf32> to vector<1x128xf32>
    %499 = vector.broadcast %497 : vector<8x1xf32> to vector<8x128xf32>
    %500 = vector.broadcast %498 : vector<1x128xf32> to vector<8x128xf32>
    %501 = arith.mulf %499, %500 : vector<8x128xf32>
    %502 = arith.addf %496, %501 : vector<8x128xf32>
    %503 = vector.broadcast %2 : vector<8x1xf32> to vector<8x128xf32>
    %504 = arith.addf %502, %503 : vector<8x128xf32>
    %cst_87 = arith.constant 0.000000e+00 : f32
    %505 = vector.broadcast %cst_87 : f32 to vector<8x128xf32>
    %506 = arith.cmpf ogt, %504, %505 : vector<8x128xf32>
    %507 = vector.broadcast %0 : f32 to vector<8x128xf32>
    %508 = arith.mulf %507, %504 : vector<8x128xf32>
    %509 = arith.select %506, %504, %508 : vector<8x128xi1>, vector<8x128xf32>
    %cst_88 = arith.constant 0.000000e+00 : f32
    %510 = vector.shape_cast %11 : vector<1x128xi1> to vector<1x128xi1>
    %511 = vector.broadcast %510 : vector<1x128xi1> to vector<8x128xi1>
    %512 = vector.broadcast %cst_88 : f32 to vector<8x128xf32>
    %513 = arith.select %511, %509, %512 : vector<8x128xi1>, vector<8x128xf32>
    %cst_89 = arith.constant dense<0.000000e+00> : vector<8x128xf32>
    %514 = tpu.matmul %513, %12, %cst_89 {dimension_numbers = #tpu.dot_dimension_numbers<[1], [0], [0], [1], [0, 0, 1, 1], [], []>} : vector<8x128xf32>, vector<128x128xf32>, vector<8x128xf32> -> vector<8x128xf32>
    %515 = vector.extract_strided_slice %514 {offsets = [0, 0], sizes = [8, 1], strides = [1, 1]} : vector<8x128xf32> to vector<8x1xf32>
    %516 = vector.shape_cast %515 : vector<8x1xf32> to vector<1x8x1xf32>
    %cst_90 = arith.constant dense<0.000000e+00> : vector<1xf32>
    %517 = vector.multi_reduction <add>, %516, %cst_90 [1, 2] : vector<1x8x1xf32> to vector<1xf32>
    %518 = vector.shape_cast %517 : vector<1xf32> to vector<1x1x1xf32>
    %519 = vector.extract %518[0, 0, 0] : f32 from vector<1x1x1xf32>
    %cst_91 = arith.constant 0.00130208337 : f32
    %520 = arith.mulf %519, %cst_91 : f32
    %521 = vector.broadcast %520 : f32 to vector<8x128xf32>
    %522 = arith.subf %509, %521 : vector<8x128xf32>
    %cst_92 = arith.constant 0.000000e+00 : f32
    %523 = vector.shape_cast %11 : vector<1x128xi1> to vector<1x128xi1>
    %524 = vector.broadcast %523 : vector<1x128xi1> to vector<8x128xi1>
    %525 = vector.broadcast %cst_92 : f32 to vector<8x128xf32>
    %526 = arith.select %524, %522, %525 : vector<8x128xi1>, vector<8x128xf32>
    %527 = arith.mulf %526, %526 : vector<8x128xf32>
    %cst_93 = arith.constant dense<0.000000e+00> : vector<8x128xf32>
    %528 = tpu.matmul %527, %12, %cst_93 {dimension_numbers = #tpu.dot_dimension_numbers<[1], [0], [0], [1], [0, 0, 1, 1], [], []>} : vector<8x128xf32>, vector<128x128xf32>, vector<8x128xf32> -> vector<8x128xf32>
    %529 = vector.extract_strided_slice %528 {offsets = [0, 0], sizes = [8, 1], strides = [1, 1]} : vector<8x128xf32> to vector<8x1xf32>
    %530 = vector.shape_cast %529 : vector<8x1xf32> to vector<1x8x1xf32>
    %cst_94 = arith.constant dense<0.000000e+00> : vector<1xf32>
    %531 = vector.multi_reduction <add>, %530, %cst_94 [1, 2] : vector<1x8x1xf32> to vector<1xf32>
    %532 = vector.shape_cast %531 : vector<1xf32> to vector<1x1x1xf32>
    %533 = vector.extract %532[0, 0, 0] : f32 from vector<1x1x1xf32>
    %cst_95 = arith.constant 0.00130208337 : f32
    %534 = arith.mulf %533, %cst_95 : f32
    %cst_96 = arith.constant 9.99999974E-6 : f32
    %535 = arith.addf %534, %cst_96 : f32
    %536 = math.rsqrt %535 : f32
    %537 = vector.broadcast %536 : f32 to vector<8x128xf32>
    %538 = arith.mulf %522, %537 : vector<8x128xf32>
    %539 = vector.broadcast %7 : vector<8x1xf32> to vector<8x128xf32>
    %540 = arith.mulf %538, %539 : vector<8x128xf32>
    %541 = vector.broadcast %8 : vector<8x1xf32> to vector<8x128xf32>
    %542 = arith.addf %540, %541 : vector<8x128xf32>
    %c2_i32_97 = arith.constant 2 : i32
    %543 = tpu.dynamic_rotate %542 by %c2_i32_97 dim 1 : vector<8x128xf32>, i32 -> vector<8x128xf32>
    %c2_i32_98 = arith.constant 2 : i32
    %544 = vector.broadcast %c2_i32_98 : i32 to vector<1x128xi32>
    %545 = arith.cmpi sge, %9, %544 : vector<1x128xi32>
    %cst_99 = arith.constant 0.000000e+00 : f32
    %546 = vector.shape_cast %545 : vector<1x128xi1> to vector<1x128xi1>
    %547 = vector.broadcast %546 : vector<1x128xi1> to vector<8x128xi1>
    %548 = vector.broadcast %cst_99 : f32 to vector<8x128xf32>
    %549 = arith.select %547, %543, %548 : vector<8x128xi1>, vector<8x128xf32>
    %550 = vector.extract_strided_slice %5 {offsets = [0, 0], sizes = [8, 1], strides = [1, 1]} : vector<8x3xf32> to vector<8x1xf32>
    %551 = vector.broadcast %550 : vector<8x1xf32> to vector<8x128xf32>
    %552 = arith.mulf %551, %549 : vector<8x128xf32>
    %553 = vector.extract_strided_slice %5 {offsets = [0, 1], sizes = [8, 1], strides = [1, 1]} : vector<8x3xf32> to vector<8x1xf32>
    %554 = vector.broadcast %553 : vector<8x1xf32> to vector<8x128xf32>
    %555 = arith.mulf %554, %542 : vector<8x128xf32>
    %556 = arith.addf %552, %555 : vector<8x128xf32>
    %c126_i32_100 = arith.constant 126 : i32
    %557 = tpu.dynamic_rotate %542 by %c126_i32_100 dim 1 : vector<8x128xf32>, i32 -> vector<8x128xf32>
    %c94_i32_101 = arith.constant 94 : i32
    %558 = vector.broadcast %c94_i32_101 : i32 to vector<1x128xi32>
    %559 = arith.cmpi slt, %9, %558 : vector<1x128xi32>
    %cst_102 = arith.constant 0.000000e+00 : f32
    %560 = vector.shape_cast %559 : vector<1x128xi1> to vector<1x128xi1>
    %561 = vector.broadcast %560 : vector<1x128xi1> to vector<8x128xi1>
    %562 = vector.broadcast %cst_102 : f32 to vector<8x128xf32>
    %563 = arith.select %561, %557, %562 : vector<8x128xi1>, vector<8x128xf32>
    %564 = vector.extract_strided_slice %5 {offsets = [0, 2], sizes = [8, 1], strides = [1, 1]} : vector<8x3xf32> to vector<8x1xf32>
    %565 = vector.broadcast %564 : vector<8x1xf32> to vector<8x128xf32>
    %566 = arith.mulf %565, %563 : vector<8x128xf32>
    %567 = arith.addf %556, %566 : vector<8x128xf32>
    %568 = vector.broadcast %6 : vector<8x1xf32> to vector<8x128xf32>
    %569 = arith.addf %567, %568 : vector<8x128xf32>
    %cst_103 = arith.constant 0.000000e+00 : f32
    %570 = vector.broadcast %cst_103 : f32 to vector<8x128xf32>
    %571 = arith.cmpf ogt, %569, %570 : vector<8x128xf32>
    %572 = vector.broadcast %0 : f32 to vector<8x128xf32>
    %573 = arith.mulf %572, %569 : vector<8x128xf32>
    %574 = arith.select %571, %569, %573 : vector<8x128xi1>, vector<8x128xf32>
    %575 = vector.extract_strided_slice %3 {offsets = [0, 0], sizes = [4, 1], strides = [1, 1]} : vector<4x8xf32> to vector<4x1xf32>
    %576 = vector.extract_strided_slice %574 {offsets = [0, 0], sizes = [1, 128], strides = [1, 1]} : vector<8x128xf32> to vector<1x128xf32>
    %577 = vector.broadcast %575 : vector<4x1xf32> to vector<4x128xf32>
    %578 = vector.broadcast %576 : vector<1x128xf32> to vector<4x128xf32>
    %579 = arith.mulf %577, %578 : vector<4x128xf32>
    %580 = vector.extract_strided_slice %3 {offsets = [0, 1], sizes = [4, 1], strides = [1, 1]} : vector<4x8xf32> to vector<4x1xf32>
    %581 = vector.extract_strided_slice %574 {offsets = [1, 0], sizes = [1, 128], strides = [1, 1]} : vector<8x128xf32> to vector<1x128xf32>
    %582 = vector.broadcast %580 : vector<4x1xf32> to vector<4x128xf32>
    %583 = vector.broadcast %581 : vector<1x128xf32> to vector<4x128xf32>
    %584 = arith.mulf %582, %583 : vector<4x128xf32>
    %585 = arith.addf %579, %584 : vector<4x128xf32>
    %586 = vector.extract_strided_slice %3 {offsets = [0, 2], sizes = [4, 1], strides = [1, 1]} : vector<4x8xf32> to vector<4x1xf32>
    %587 = vector.extract_strided_slice %574 {offsets = [2, 0], sizes = [1, 128], strides = [1, 1]} : vector<8x128xf32> to vector<1x128xf32>
    %588 = vector.broadcast %586 : vector<4x1xf32> to vector<4x128xf32>
    %589 = vector.broadcast %587 : vector<1x128xf32> to vector<4x128xf32>
    %590 = arith.mulf %588, %589 : vector<4x128xf32>
    %591 = arith.addf %585, %590 : vector<4x128xf32>
    %592 = vector.extract_strided_slice %3 {offsets = [0, 3], sizes = [4, 1], strides = [1, 1]} : vector<4x8xf32> to vector<4x1xf32>
    %593 = vector.extract_strided_slice %574 {offsets = [3, 0], sizes = [1, 128], strides = [1, 1]} : vector<8x128xf32> to vector<1x128xf32>
    %594 = vector.broadcast %592 : vector<4x1xf32> to vector<4x128xf32>
    %595 = vector.broadcast %593 : vector<1x128xf32> to vector<4x128xf32>
    %596 = arith.mulf %594, %595 : vector<4x128xf32>
    %597 = arith.addf %591, %596 : vector<4x128xf32>
    %598 = vector.extract_strided_slice %3 {offsets = [0, 4], sizes = [4, 1], strides = [1, 1]} : vector<4x8xf32> to vector<4x1xf32>
    %599 = vector.extract_strided_slice %574 {offsets = [4, 0], sizes = [1, 128], strides = [1, 1]} : vector<8x128xf32> to vector<1x128xf32>
    %600 = vector.broadcast %598 : vector<4x1xf32> to vector<4x128xf32>
    %601 = vector.broadcast %599 : vector<1x128xf32> to vector<4x128xf32>
    %602 = arith.mulf %600, %601 : vector<4x128xf32>
    %603 = arith.addf %597, %602 : vector<4x128xf32>
    %604 = vector.extract_strided_slice %3 {offsets = [0, 5], sizes = [4, 1], strides = [1, 1]} : vector<4x8xf32> to vector<4x1xf32>
    %605 = vector.extract_strided_slice %574 {offsets = [5, 0], sizes = [1, 128], strides = [1, 1]} : vector<8x128xf32> to vector<1x128xf32>
    %606 = vector.broadcast %604 : vector<4x1xf32> to vector<4x128xf32>
    %607 = vector.broadcast %605 : vector<1x128xf32> to vector<4x128xf32>
    %608 = arith.mulf %606, %607 : vector<4x128xf32>
    %609 = arith.addf %603, %608 : vector<4x128xf32>
    %610 = vector.extract_strided_slice %3 {offsets = [0, 6], sizes = [4, 1], strides = [1, 1]} : vector<4x8xf32> to vector<4x1xf32>
    %611 = vector.extract_strided_slice %574 {offsets = [6, 0], sizes = [1, 128], strides = [1, 1]} : vector<8x128xf32> to vector<1x128xf32>
    %612 = vector.broadcast %610 : vector<4x1xf32> to vector<4x128xf32>
    %613 = vector.broadcast %611 : vector<1x128xf32> to vector<4x128xf32>
    %614 = arith.mulf %612, %613 : vector<4x128xf32>
    %615 = arith.addf %609, %614 : vector<4x128xf32>
    %616 = vector.extract_strided_slice %3 {offsets = [0, 7], sizes = [4, 1], strides = [1, 1]} : vector<4x8xf32> to vector<4x1xf32>
    %617 = vector.extract_strided_slice %574 {offsets = [7, 0], sizes = [1, 128], strides = [1, 1]} : vector<8x128xf32> to vector<1x128xf32>
    %618 = vector.broadcast %616 : vector<4x1xf32> to vector<4x128xf32>
    %619 = vector.broadcast %617 : vector<1x128xf32> to vector<4x128xf32>
    %620 = arith.mulf %618, %619 : vector<4x128xf32>
    %621 = arith.addf %615, %620 : vector<4x128xf32>
    %622 = vector.broadcast %4 : vector<4x1xf32> to vector<4x128xf32>
    %623 = arith.addf %621, %622 : vector<4x128xf32>
    %624 = arith.addf %479, %623 : vector<4x128xf32>
    %625 = arith.index_cast %476 : i32 to index
    %c0_104 = arith.constant 0 : index
    %c0_105 = arith.constant 0 : index
    %626 = vector.load %arg11[%625, %c0_104, %c0_105] : memref<4x4x128xf32, #tpu.memory_space<vmem>>, vector<1x4x128xf32>
    %627 = vector.shape_cast %626 : vector<1x4x128xf32> to vector<4x128xf32>
    %628 = vector.shape_cast %624 : vector<4x128xf32> to vector<1x4x128xf32>
    tpu.vector_store %arg11[%625, %c0_104, %c0_105], %628 {strides = array<i32>} : memref<4x4x128xf32, #tpu.memory_space<vmem>>, vector<1x4x128xf32>,
    %c4_i32 = arith.constant 4 : i32
    return
  }
  func.func @transform_0(%arg0: i32) -> (i32, i32, i32) {
    %c0_i32 = arith.constant 0 : i32
    %c0_i32_0 = arith.constant 0 : i32
    %c0_i32_1 = arith.constant 0 : i32
    return %arg0, %c0_i32, %c0_i32_0 : i32, i32, i32
  }
  func.func @transform_1(%arg0: i32) -> (i32, i32) {
    %c0_i32 = arith.constant 0 : i32
    %c0_i32_0 = arith.constant 0 : i32
    %c0_i32_1 = arith.constant 0 : i32
    return %c0_i32, %c0_i32_0 : i32, i32
  }
  func.func @transform_2(%arg0: i32) -> (i32, i32) {
    %c0_i32 = arith.constant 0 : i32
    %c0_i32_0 = arith.constant 0 : i32
    %c0_i32_1 = arith.constant 0 : i32
    return %c0_i32, %c0_i32_0 : i32, i32
  }
  func.func @transform_3(%arg0: i32) -> (i32, i32) {
    %c0_i32 = arith.constant 0 : i32
    %c0_i32_0 = arith.constant 0 : i32
    %c0_i32_1 = arith.constant 0 : i32
    return %c0_i32, %c0_i32_0 : i32, i32
  }
  func.func @transform_4(%arg0: i32) -> (i32, i32) {
    %c0_i32 = arith.constant 0 : i32
    %c0_i32_0 = arith.constant 0 : i32
    %c0_i32_1 = arith.constant 0 : i32
    return %c0_i32, %c0_i32_0 : i32, i32
  }
  func.func @transform_5(%arg0: i32) -> (i32, i32) {
    %c0_i32 = arith.constant 0 : i32
    %c0_i32_0 = arith.constant 0 : i32
    %c0_i32_1 = arith.constant 0 : i32
    return %c0_i32, %c0_i32_0 : i32, i32
  }
  func.func @transform_6(%arg0: i32) -> (i32, i32) {
    %c0_i32 = arith.constant 0 : i32
    %c0_i32_0 = arith.constant 0 : i32
    %c0_i32_1 = arith.constant 0 : i32
    return %c0_i32, %c0_i32_0 : i32, i32
  }
  func.func @transform_7(%arg0: i32) -> (i32, i32) {
    %c0_i32 = arith.constant 0 : i32
    %c0_i32_0 = arith.constant 0 : i32
    %c0_i32_1 = arith.constant 0 : i32
    return %c0_i32, %c0_i32_0 : i32, i32
  }
  func.func @transform_8(%arg0: i32) -> (i32, i32) {
    %c0_i32 = arith.constant 0 : i32
    %c0_i32_0 = arith.constant 0 : i32
    %c0_i32_1 = arith.constant 0 : i32
    return %c0_i32, %c0_i32_0 : i32, i32
  }
  func.func @transform_9(%arg0: i32) -> i32 {
    %c0_i32 = arith.constant 0 : i32
    %c0_i32_0 = arith.constant 0 : i32
    return %c0_i32 : i32
  }
  func.func @transform_10(%arg0: i32) -> (i32, i32, i32) {
    %c0_i32 = arith.constant 0 : i32
    %c0_i32_0 = arith.constant 0 : i32
    %c0_i32_1 = arith.constant 0 : i32
    return %arg0, %c0_i32, %c0_i32_0 : i32, i32, i32
  }
}

</mosaic_0001>

<bundles_post_ra>
// kernel: tpu_custom_call.1
= control target key start
LH: loop header
LB: loop body
LE: loop exit
PB: predicated region body
PF: predicated region fallthrough
CT: control target
= control target key end

     0   :  { %v1886_v1 = vmov 0   ;;  %v1887_v2 = vmov 2   ;;  %v1888_v3 = vmov 0.0|0.0   ;;  %s2483_s0 = inlined_call_operand.vmem [shape: f32[4,4,128], index: 0, kind: input, shape index: {}]   ;;  %s2484_s1 = inlined_call_operand.vmem [shape: f32[8,4], index: 1, kind: input, shape index: {}]   ;;  %s2485_s2 = inlined_call_operand.vmem [shape: f32[8,1], index: 2, kind: input, shape index: {}]   ;;  %s2486_s3 = inlined_call_operand.vmem [shape: f32[4,8], index: 3, kind: input, shape index: {}]   ;;  %s2487_s4 = inlined_call_operand.vmem [shape: f32[4,1], index: 4, kind: input, shape index: {}]   ;;  %s2488_s5 = inlined_call_operand.vmem [shape: f32[8,3], index: 5, kind: input, shape index: {}]   ;;  %s2489_s6 = inlined_call_operand.vmem [shape: f32[8,1], index: 6, kind: input, shape index: {}]   ;;  %s2490_s7 = inlined_call_operand.vmem [shape: f32[8,1], index: 7, kind: input, shape index: {}]   ;;  %s2491_s8 = inlined_call_operand.vmem [shape: f32[8,1], index: 8, kind: input, shape index: {}]   ;;  %s2492_s9 = inlined_call_operand.<no memory space> [shape: f32[1], index: 9, kind: input, shape index: {}]   ;;  %s2493_s10 = inlined_call_operand.hbm [shape: f32[4,4,128], index: 10, kind: output, shape index: {}]  }
   0x1   :  { %v38_v0 = vld [vmem:[%s2484_s1] sm:$0xff]  ;;  %1833 = vset.pattern.permute.xlu0 %v1886_v1  ;;  %1835 = vset.pattern.permute.xlu1 %v1887_v2 }
   0x2   :  { %52 = vperm.xlu0 %1833, %v38_v0   ;;  %71 = vperm.xlu1 %1835, %v38_v0  }
   0x3   :  { %1664 = vmatprep.subr.bf16.mxu0 %v1888_v3  ;;  %1680 = vmatprep.subr.bf16.mxu1 %v1888_v3 }
   0x4   :  { %16 = vsyncpa [#allocation4], 0  ;;  %v1889_v4 = vmov 1.0|1.0   ;;  %v1890_v5 = vmov 1   ;;  %v1891_v6 = vmov 3   ;;  %v46_v9 = vlaneseq }
   0x5   :  { %1665 = vmatpush3.bf16.msra.mxu0 %v1889_v4  ;;  %1681 = vmatpush3.bf16.msra.mxu1 %v1889_v4  ;;  %v39_v7 = vld [vmem:[%s2485_s2] sm:$0xff]  ;;  %vm1892_vm0 = vmmov 0   ;;  %v1893_v8 = vmov 0.0   ;;  %v1244_v13 = vld [vmem:[%s2483_s0 + $0x8] sm:$0xf]  ;;  %v2052_v57 = vstv %s2492_s9  ;;  %vm173_vm6 = vcmask 7168  }
   0x6   :  { %1666 = vmatprep.subr.bf16.mxu0 %v1888_v3  ;;  %1682 = vmatprep.subr.bf16.mxu1 %v1888_v3  ;;  %v2008_v10 = vshrl.u32 %v46_v9, 7  ;;  %v49_v11 = vld [vmem:[%s2483_s0] sm:$0xf]  ;;  %v1246_v14 = vld [vmem:[%s2483_s0 + $0xc] sm:$0xf]  ;;  %v2047_v56 = vand.u32 127, %v46_v9 }
   0x7   :  { %1834 = vset.pattern.permute.xlu0 %v1890_v5  ;;  %1836 = vset.pattern.permute.xlu1 %v1891_v6  ;;  %v2068_v61 = vld [vmem:[%s2483_s0 + $0x4] sm:$0xf]  ;;  %s1897_s27 = smov 126  }
   0x8   :  { %61 = vperm.xlu0 %1834, %v38_v0   ;;  %81 = vperm.xlu1 %1836, %v38_v0   ;;  %v2014_v12 = vsub.s32 0, %v2008_v10  ;;  %v2023_v15 = vsub.s32 2, %v2008_v10  ;;  %v2026_v16 = vsub.s32 1, %v2008_v10  ;;  %v2029_v17 = vsub.s32 3, %v2008_v10 }
   0x9   :  { %1667 = vmatpush3.bf16.msra.mxu0 %v1889_v4  ;;  %1683 = vmatpush3.bf16.msra.mxu1 %v1889_v4  ;;  %vm48_vm1 = vcmp.lt.s32.totalorder %v2047_v56, 96  ;;  %vm290_vm7 = vcmp.ge.s32.totalorder %v2047_v56, 2  ;;  %vm308_vm8 = vcmp.lt.s32.totalorder %v2047_v56, 94 }
   0xa   :  { %1668 = vmatprep.subr.bf16.mxu0 %v1888_v3  ;;  %1684 = vmatprep.subr.bf16.mxu1 %v1888_v3  ;;  %v58_v20 = vrot.slane %v49_v11, %v2014_v12  ;;  %v690_v21 = vrot.slane %v1244_v13, %v2014_v12  ;;  %v960_v22 = vrot.slane %v1246_v14, %v2014_v12 }
   0xb   :  { %1416 = vmatprep.mubr.msk.f32.mxu0 %vm1892_vm0, %v1893_v8  ;;  %1451 = vmatprep.mubr.msk.f32.mxu1 %vm1892_vm0, %v1893_v8  ;;  %v77_v23 = vrot.slane %v49_v11, %v2023_v15  ;;  %v67_v24 = vrot.slane %v49_v11, %v2026_v16  ;;  %v695_v25 = vrot.slane %v1244_v13, %v2026_v16 }
   0xc   :  { %1837 = vset.pattern.permute.xlu1 %v1886_v1  ;;  %1838 = vset.pattern.permute.xlu0 %v1886_v1  ;;  %v965_v26 = vrot.slane %v1246_v14, %v2026_v16  ;;  %v701_v27 = vrot.slane %v1244_v13, %v2023_v15  ;;  %v971_v28 = vrot.slane %v1246_v14, %v2023_v15 }
   0xd   :  { %92 = vperm.xlu1 %1837, %v39_v7   ;;  %1669 = vmatpush3.bf16.msra.mxu0 %v1889_v4  ;;  %v87_v29 = vrot.slane %v49_v11, %v2029_v17  ;;  %v707_v30 = vrot.slane %v1244_v13, %v2029_v17  ;;  %v977_v31 = vrot.slane %v1246_v14, %v2029_v17 }
   0xe   :  { %1670 = vmatprep.subr.bf16.mxu0 %v1888_v3  ;;  %1685 = vmatpush3.bf16.msra.mxu1 %v1889_v4  ;;  %v425_v62 = vrot.slane %v2068_v61, %v2026_v16  ;;  %v420_v63 = vrot.slane %v2068_v61, %v2014_v12  ;;  %v431_v9 = vrot.slane %v2068_v61, %v2023_v15 }
   0xf   :  { %1686 = vmatprep.subr.bf16.mxu1 %v1888_v3  ;;  %v437_v13 = vrot.slane %v2068_v61, %v2029_v17 }
  0x11   :  { %1671 = vmatpush3.bf16.msra.mxu0 %v1889_v4 }
  0x12   :  { %1672 = vmatprep.subr.bf16.mxu0 %v1888_v3  ;;  %1687 = vmatpush3.bf16.msra.mxu1 %v1889_v4 }
  0x13   :  { %1688 = vmatprep.subr.bf16.mxu1 %v1888_v3 }
  0x15   :  { %1673 = vmatpush3.bf16.msra.mxu0 %v1889_v4 }
  0x16   :  { %1674 = vmatprep.subr.bf16.mxu0 %v1888_v3  ;;  %1689 = vmatpush3.bf16.msra.mxu1 %v1889_v4 }
  0x17   :  { %1690 = vmatprep.subr.bf16.mxu1 %v1888_v3 }
  0x19   :  { %1675 = vmatpush3.bf16.msra.mxu0 %v1889_v4 }
  0x1a   :  { %1676 = vmatprep.subr.bf16.mxu0 %v1888_v3  ;;  %1691 = vmatpush3.bf16.msra.mxu1 %v1889_v4 }
  0x1b   :  { %1692 = vmatprep.subr.bf16.mxu1 %v1888_v3 }
  0x1d   :  { %1677 = vmatpush3.bf16.msra.mxu0 %v1889_v4 }
  0x1e   :  { %1678 = vmatprep.subr.bf16.mxu0 %v1888_v3  ;;  %1693 = vmatpush3.bf16.msra.mxu1 %v1889_v4 }
  0x1f   :  { %1694 = vmatprep.subr.bf16.mxu1 %v1888_v3 }
  0x21   :  { %1679 = vmatpush3.bf16.msra.mxu0 %v1889_v4 }
  0x22   :  { %1696 = vmatprep.subr.bf16.mxu0 %v1888_v3  ;;  %1695 = vmatpush3.bf16.msra.mxu1 %v1889_v4 }
  0x23   :  { %1712 = vmatprep.subr.bf16.mxu1 %v1888_v3 }
  0x81   :  { %v53_v18 = vpop.permute.xlu0 %52  ;;  %v72_v19 = vpop.permute.xlu1 %71 }
  0x82   :  { %v59_v32 = vmul.f32 %v58_v20, %v53_v18  ;;  %v691_v33 = vmul.f32 %v690_v21, %v53_v18  ;;  %v961_v34 = vmul.f32 %v960_v22, %v53_v18  ;;  %v78_v37 = vmul.f32 %v77_v23, %v72_v19 }
  0x83   :  { %v702_v41 = vmul.f32 %v701_v27, %v72_v19  ;;  %v972_v42 = vmul.f32 %v971_v28, %v72_v19  ;;  %v421_v7 = vmul.f32 %v420_v63, %v53_v18  ;;  %v432_v14 = vmul.f32 %v431_v9, %v72_v19 }
  0x87   :  { %v62_v35 = vpop.permute.xlu0 %61  ;;  %v82_v36 = vpop.permute.xlu1 %81 }
  0x88   :  { %v68_v38 = vmul.f32 %v67_v24, %v62_v35  ;;  %v696_v39 = vmul.f32 %v695_v25, %v62_v35  ;;  %v966_v40 = vmul.f32 %v965_v26, %v62_v35  ;;  %v88_v43 = vmul.f32 %v87_v29, %v82_v36 }
  0x89   :  { %v708_v44 = vmul.f32 %v707_v30, %v82_v36  ;;  %v978_v48 = vmul.f32 %v977_v31, %v82_v36  ;;  %v426_v0 = vmul.f32 %v425_v62, %v62_v35  ;;  %v438_v20 = vmul.f32 %v437_v13, %v82_v36 }
  0x8a   :  { %v69_v45 = vadd.f32 %v68_v38, %v59_v32  ;;  %v697_v46 = vadd.f32 %v696_v39, %v691_v33  ;;  %v967_v47 = vadd.f32 %v966_v40, %v961_v34 }
  0x8b   :  { %v427_v11 = vadd.f32 %v426_v0, %v421_v7 }
  0x8c   :  { %v79_v49 = vadd.f32 %v78_v37, %v69_v45  ;;  %v703_v50 = vadd.f32 %v702_v41, %v697_v46  ;;  %v973_v51 = vadd.f32 %v972_v42, %v967_v47  ;;  %v2043_v52 = vpop.permute.xlu1 %92 }
  0x8d   :  { %v433_v21 = vadd.f32 %v432_v14, %v427_v11 }
  0x8e   :  { %v89_v53 = vadd.f32 %v88_v43, %v79_v49  ;;  %v709_v54 = vadd.f32 %v708_v44, %v703_v50  ;;  %v2045_v55 = vadd.f32 %v978_v48, %v973_v51 }
  0x8f   :  { %v439_v18 = vadd.f32 %v438_v20, %v433_v21 }
  0x90   :  { %v95_v58 = vadd.f32 %v2043_v52, %v89_v53  ;;  %v710_v24 = vadd.f32 %v709_v54, %v2043_v52  ;;  %v980_v27 = vadd.f32 %v2045_v55, %v2043_v52 }
  0x91   :  { %v440_v22 = vadd.f32 %v439_v18, %v2043_v52 }
  0x92   :  { %vm96_vm2 = vcmp.gt.f32.partialorder %v95_v58, 0.0  ;;  %v98_v59 = vmul.f32 %v2052_v57, %v95_v58  ;;  %v712_v25 = vmul.f32 %v710_v24, %v2052_v57  ;;  %vm711_vm4 = vcmp.gt.f32.partialorder %v710_v24, 0.0 }
  0x93   :  { %v442_v19 = vmul.f32 %v440_v22, %v2052_v57  ;;  %vm441_vm3 = vcmp.gt.f32.partialorder %v440_v22, 0.0  ;;  %v982_v28 = vmul.f32 %v980_v27, %v2052_v57  ;;  %vm981_vm5 = vcmp.gt.f32.partialorder %v980_v27, 0.0 }
  0x94   :  { %v2057_v60 = vsel %vm96_vm2, %v95_v58, %v98_v59  ;;  %v2120_v26 = vsel %vm711_vm4, %v710_v24, %v712_v25  ;;  %v44_v58 = vld [vmem:[%s2490_s7] sm:$0xff] }
  0x95   :  { %1417 = vmatmul.mubr.msk.f32.vlgmr.msra.gmra.mrb[0].mxu0 %vm48_vm1, %v2057_v60  ;;  %v2095_v23 = vsel %vm441_vm3, %v440_v22, %v442_v19  ;;  %v2145_v29 = vsel %vm981_vm5, %v980_v27, %v982_v28 }
  0x96   :  { %1697 = vmatpush3.bf16.msra.mxu0 %v1889_v4  ;;  %1486 = vmatprep.mubr.msk.f32.mxu0 %vm1892_vm0, %v1893_v8 }
  0x97   :  { %1698 = vmatprep.subr.bf16.mxu0 %v1888_v3 }
  0x9a   :  { %1699 = vmatpush3.bf16.msra.mxu0 %v1889_v4 }
  0x9b   :  { %1700 = vmatprep.subr.bf16.mxu0 %v1888_v3 }
  0x9e   :  { %1701 = vmatpush3.bf16.msra.mxu0 %v1889_v4 }
  0x9f   :  { %1702 = vmatprep.subr.bf16.mxu0 %v1888_v3 }
  0xa2   :  { %1703 = vmatpush3.bf16.msra.mxu0 %v1889_v4 }
  0xa3   :  { %1704 = vmatprep.subr.bf16.mxu0 %v1888_v3 }
  0xa6   :  { %1705 = vmatpush3.bf16.msra.mxu0 %v1889_v4 }
  0xa7   :  { %1706 = vmatprep.subr.bf16.mxu0 %v1888_v3 }
  0xaa   :  { %1707 = vmatpush3.bf16.msra.mxu0 %v1889_v4 }
  0xab   :  { %1708 = vmatprep.subr.bf16.mxu0 %v1888_v3 }
  0xae   :  { %1709 = vmatpush3.bf16.msra.mxu0 %v1889_v4 }
  0xaf   :  { %1710 = vmatprep.subr.bf16.mxu0 %v1888_v3 }
  0xb2   :  { %1711 = vmatpush3.bf16.msra.mxu0 %v1889_v4 }
  0xb3   :  { %1728 = vmatprep.subr.bf16.mxu0 %v1888_v3 }
  0xb5   :  { %1487 = vmatmul.mubr.msk.f32.vlgmr.msra.gmra.mrb[2].mxu0 %vm48_vm1, %v2095_v23 }
  0xb6   :  { %1729 = vmatpush3.bf16.msra.mxu0 %v1889_v4  ;;  %1556 = vmatprep.mubr.msk.f32.mxu0 %vm1892_vm0, %v1893_v8 }
  0xb7   :  { %1730 = vmatprep.subr.bf16.mxu0 %v1888_v3 }
  0xba   :  { %1731 = vmatpush3.bf16.msra.mxu0 %v1889_v4 }
  0xbb   :  { %1732 = vmatprep.subr.bf16.mxu0 %v1888_v3 }
  0xbe   :  { %1733 = vmatpush3.bf16.msra.mxu0 %v1889_v4 }
  0xbf   :  { %1734 = vmatprep.subr.bf16.mxu0 %v1888_v3 }
  0xc2   :  { %1735 = vmatpush3.bf16.msra.mxu0 %v1889_v4 }
  0xc3   :  { %1736 = vmatprep.subr.bf16.mxu0 %v1888_v3 }
  0xc6   :  { %1737 = vmatpush3.bf16.msra.mxu0 %v1889_v4 }
  0xc7   :  { %1738 = vmatprep.subr.bf16.mxu0 %v1888_v3 }
  0xca   :  { %1739 = vmatpush3.bf16.msra.mxu0 %v1889_v4 }
  0xcb   :  { %1740 = vmatprep.subr.bf16.mxu0 %v1888_v3 }
  0xce   :  { %1741 = vmatpush3.bf16.msra.mxu0 %v1889_v4 }
  0xcf   :  { %1742 = vmatprep.subr.bf16.mxu0 %v1888_v3 }
  0xd2   :  { %1743 = vmatpush3.bf16.msra.mxu0 %v1889_v4 }
  0xd3   :  { %1760 = vmatprep.subr.bf16.mxu0 %v1888_v3 }
  0xd5   :  { %1557 = vmatmul.mubr.msk.f32.vlgmr.msra.gmra.mrb[4].mxu0 %vm48_vm1, %v2120_v26 }
  0xd6   :  { %1761 = vmatpush3.bf16.msra.mxu0 %v1889_v4  ;;  %1626 = vmatprep.mubr.msk.f32.mxu0 %vm1892_vm0, %v1893_v8 }
  0xd7   :  { %1762 = vmatprep.subr.bf16.mxu0 %v1888_v3 }
  0xda   :  { %1763 = vmatpush3.bf16.msra.mxu0 %v1889_v4 }
  0xdb   :  { %1764 = vmatprep.subr.bf16.mxu0 %v1888_v3 }
  0xde   :  { %1765 = vmatpush3.bf16.msra.mxu0 %v1889_v4 }
  0xdf   :  { %1766 = vmatprep.subr.bf16.mxu0 %v1888_v3 }
  0xe2   :  { %1767 = vmatpush3.bf16.msra.mxu0 %v1889_v4 }
  0xe3   :  { %1768 = vmatprep.subr.bf16.mxu0 %v1888_v3 }
  0xe6   :  { %1769 = vmatpush3.bf16.msra.mxu0 %v1889_v4 }
  0xe7   :  { %1770 = vmatprep.subr.bf16.mxu0 %v1888_v3 }
  0xea   :  { %1771 = vmatpush3.bf16.msra.mxu0 %v1889_v4 }
  0xeb   :  { %1772 = vmatprep.subr.bf16.mxu0 %v1888_v3 }
  0xee   :  { %1773 = vmatpush3.bf16.msra.mxu0 %v1889_v4 }
  0xef   :  { %1774 = vmatprep.subr.bf16.mxu0 %v1888_v3 }
  0xf2   :  { %1775 = vmatpush3.bf16.msra.mxu0 %v1889_v4 }
  0xf5   :  { %1627 = vmatmul.mubr.msk.f32.vlgmr.msra.gmra.mrb[6].mxu0 %vm48_vm1, %v2145_v29 }
 0x168   :  { %v169_v30 = vpop.f32.mrb[0].mxu0 }
 0x169   :  { %v1418_v31 = vpop.f32.mrb[1].mxu0  ;;  %v174_v32 = vsel %vm173_vm6, %v169_v30, 0.0 }
 0x16a   :  { %175 = vadd.xlane.f32.xlu0 %v174_v32 }
 0x188   :  { %v511_v33 = vpop.f32.mrb[2].mxu0 }
 0x189   :  { %v1488_v34 = vpop.f32.mrb[3].mxu0  ;;  %v515_v35 = vsel %vm173_vm6, %v511_v33, 0.0 }
 0x18a   :  { %516 = vadd.xlane.f32.xlu0 %v515_v35 }
 0x1a8   :  { %v781_v36 = vpop.f32.mrb[4].mxu0 }
 0x1a9   :  { %v1558_v37 = vpop.f32.mrb[5].mxu0  ;;  %v785_v54 = vsel %vm173_vm6, %v781_v36, 0.0 }
 0x1c8   :  { %v1051_v38 = vpop.f32.mrb[6].mxu0 }
 0x1c9   :  { %v1628_v39 = vpop.f32.mrb[7].mxu0  ;;  %v1055_v55 = vsel %vm173_vm6, %v1051_v38, 0.0 }
 0x1f7   :  { %v176_v40 = vpop.xlane.xlu0 %175 }
 0x1f8   :  { %v177_v41 = vrot.slane %v176_v40, 4 }
 0x1fa   :  { %v178_v42 = vadd.f32 %v177_v41, %v176_v40 }
 0x1fc   :  { %v179_v43 = vrot.slane %v178_v42, 2 }
 0x1fe   :  { %v180_v44 = vadd.f32 %v179_v43, %v178_v42 }
 0x200   :  { %v181_v45 = vrot.slane %v180_v44, 1 }
 0x202   :  { %v182_v46 = vadd.f32 %v181_v45, %v180_v44 }
 0x204   :  { %1792 = vpush %v182_v46 }
 0x217   :  { %v517_v11 = vpop.xlane.xlu0 %516 }
 0x218   :  { %v518_v13 = vrot.slane %v517_v11, 4 }
 0x21a   :  { %v519_v14 = vadd.f32 %v518_v13, %v517_v11 }
 0x21c   :  { %v520_v20 = vrot.slane %v519_v14, 2 }
 0x21e   :  { %v521_v18 = vadd.f32 %v520_v20, %v519_v14 }
 0x220   :  { %v522_v22 = vrot.slane %v521_v18, 1 }
 0x222   :  { %v523_v24 = vadd.f32 %v522_v22, %v521_v18 }
 0x235   :  { %s1793_s24 = spop %1792 }
 0x236   :  { %s184_s25 = smul.f32 0.0013020834, %s1793_s24 }
 0x238   :  { %v185_v47 = vstv %s184_s25 }
 0x239   :  { %v2153_v48 = vsub.f32 %v2057_v60, %v185_v47 }
 0x23b   :  { %v187_v49 = vsel %vm48_vm1, %v2153_v48, 0.0 }
 0x23c   :  { %v188_v50 = vmul.f32 %v187_v49, %v187_v49 }
 0x23e   :  { %1452 = vmatmul.mubr.f32.vlgmr.msra.gmra.mrb[0].mxu1 %v188_v50 }
 0x23f   :  { %1713 = vmatpush3.bf16.msra.mxu1 %v1889_v4  ;;  %1521 = vmatprep.mubr.msk.f32.mxu1 %vm1892_vm0, %v1893_v8 }
 0x240   :  { %1714 = vmatprep.subr.bf16.mxu1 %v1888_v3 }
 0x243   :  { %1715 = vmatpush3.bf16.msra.mxu1 %v1889_v4 }
 0x244   :  { %1716 = vmatprep.subr.bf16.mxu1 %v1888_v3 }
 0x247   :  { %1717 = vmatpush3.bf16.msra.mxu1 %v1889_v4 }
 0x248   :  { %1718 = vmatprep.subr.bf16.mxu1 %v1888_v3 }
 0x24b   :  { %1719 = vmatpush3.bf16.msra.mxu1 %v1889_v4 }
 0x24c   :  { %1720 = vmatprep.subr.bf16.mxu1 %v1888_v3 }
 0x24f   :  { %1721 = vmatpush3.bf16.msra.mxu1 %v1889_v4 }
 0x250   :  { %1722 = vmatprep.subr.bf16.mxu1 %v1888_v3 }
 0x253   :  { %1723 = vmatpush3.bf16.msra.mxu1 %v1889_v4 }
 0x254   :  { %1724 = vmatprep.subr.bf16.mxu1 %v1888_v3 }
 0x257   :  { %1725 = vmatpush3.bf16.msra.mxu1 %v1889_v4 }
 0x258   :  { %1726 = vmatprep.subr.bf16.mxu1 %v1888_v3 }
 0x25b   :  { %1727 = vmatpush3.bf16.msra.mxu1 %v1889_v4 }
 0x25c   :  { %1744 = vmatprep.subr.bf16.mxu1 %v1888_v3 }
 0x311   :  { %v255_v51 = vpop.f32.mrb[0].mxu1 }
 0x312   :  { %v1453_v52 = vpop.f32.mrb[1].mxu1  ;;  %v259_v53 = vsel %vm173_vm6, %v255_v51, 0.0 }
 0x313   :  { %260 = vadd.xlane.f32.xlu1 %v259_v53 }
 0x317   :  { %786 = vadd.xlane.f32.xlu1 %v785_v54 }
 0x31b   :  { %1056 = vadd.xlane.f32.xlu1 %v1055_v55 }
 0x32c   :  { %278 = vperm.xlu1 %1837, %v44_v58  }
 0x3a0   :  { %v261_v59 = vpop.xlane.xlu1 %260 }
 0x3a1   :  { %v262_v60 = vrot.slane %v261_v59, 4 }
 0x3a3   :  { %v263_v62 = vadd.f32 %v262_v60, %v261_v59 }
 0x3a4   :  { %v787_v40 = vpop.xlane.xlu1 %786 }
 0x3a5   :  { %v264_v63 = vrot.slane %v263_v62, 2  ;;  %v788_v41 = vrot.slane %v787_v40, 4 }
 0x3a7   :  { %v265_v0 = vadd.f32 %v264_v63, %v263_v62  ;;  %v789_v42 = vadd.f32 %v788_v41, %v787_v40 }
 0x3a9   :  { %v266_v7 = vrot.slane %v265_v0, 1  ;;  %v790_v43 = vrot.slane %v789_v42, 2 }
 0x3ab   :  { %v267_v9 = vadd.f32 %v266_v7, %v265_v0  ;;  %v791_v45 = vadd.f32 %v790_v43, %v789_v42  ;;  %v1057_v7 = vpop.xlane.xlu1 %1056 }
 0x3ad   :  { %1794 = vpush %v267_v9  ;;  %v792_v46 = vrot.slane %v791_v45, 1  ;;  %v1058_v9 = vrot.slane %v1057_v7, 4 }
 0x3af   :  { %v793_v49 = vadd.f32 %v792_v46, %v791_v45  ;;  %v1059_v11 = vadd.f32 %v1058_v9, %v1057_v7  ;;  %v42_v45 = vld [vmem:[%s2488_s5] sm:$0xff] }
 0x3b0   :  { %v43_v46 = vld [vmem:[%s2489_s6] sm:$0xff] }
 0x3de   :  { %s1795_s28 = spop %1794 }
 0x3df   :  { %s269_s29 = smul.f32 0.0013020834, %s1795_s28 }
 0x3e1   :  { %s270_s30 = sadd.f32 1e-05, %s269_s29 }
 0x3e3   :  { %v271_v21 = vstv %s270_s30 }
 0x3e4   :  { %1851 = vrsqrt.f32 %v271_v21 }
 0x3ee   :  { %v1852_v19 = vpop.eup %1851 }
 0x3ef   :  { %1796 = vpush %v1852_v19 }
 0x3f0   :  { %1798 = vpush %v523_v24 }
 0x420   :  { %s2182_s7 = spop %1796 }
 0x421   :  { %s1799_s11 = spop %1798 }
 0x422   :  { %s525_s12 = smul.f32 0.0013020834, %s1799_s11 }
 0x424   :  { %v526_v25 = vstv %s525_s12 }
 0x425   :  { %v2185_v27 = vsub.f32 %v2095_v23, %v526_v25 }
 0x427   :  { %v528_v28 = vsel %vm48_vm1, %v2185_v27, 0.0 }
 0x428   :  { %v529_v30 = vmul.f32 %v528_v28, %v528_v28 }
 0x42a   :  { %1522 = vmatmul.mubr.f32.vlgmr.msra.gmra.mrb[2].mxu1 %v529_v30 }
 0x42b   :  { %1745 = vmatpush3.bf16.msra.mxu1 %v1889_v4  ;;  %1591 = vmatprep.mubr.msk.f32.mxu1 %vm1892_vm0, %v1893_v8 }
 0x42c   :  { %1746 = vmatprep.subr.bf16.mxu1 %v1888_v3 }
 0x42f   :  { %1747 = vmatpush3.bf16.msra.mxu1 %v1889_v4 }
 0x430   :  { %1748 = vmatprep.subr.bf16.mxu1 %v1888_v3 }
 0x433   :  { %1749 = vmatpush3.bf16.msra.mxu1 %v1889_v4 }
 0x434   :  { %1750 = vmatprep.subr.bf16.mxu1 %v1888_v3 }
 0x437   :  { %1751 = vmatpush3.bf16.msra.mxu1 %v1889_v4 }
 0x438   :  { %1752 = vmatprep.subr.bf16.mxu1 %v1888_v3 }
 0x43b   :  { %1753 = vmatpush3.bf16.msra.mxu1 %v1889_v4 }
 0x43c   :  { %1754 = vmatprep.subr.bf16.mxu1 %v1888_v3 }
 0x43f   :  { %1755 = vmatpush3.bf16.msra.mxu1 %v1889_v4 }
 0x440   :  { %1756 = vmatprep.subr.bf16.mxu1 %v1888_v3 }
 0x443   :  { %1757 = vmatpush3.bf16.msra.mxu1 %v1889_v4 }
 0x444   :  { %1758 = vmatprep.subr.bf16.mxu1 %v1888_v3 }
 0x447   :  { %1759 = vmatpush3.bf16.msra.mxu1 %v1889_v4 }
 0x448   :  { %1776 = vmatprep.subr.bf16.mxu1 %v1888_v3 }
 0x4fd   :  { %v596_v23 = vpop.f32.mrb[2].mxu1 }
 0x4fe   :  { %v1523_v31 = vpop.f32.mrb[3].mxu1  ;;  %v600_v32 = vsel %vm173_vm6, %v596_v23, 0.0  ;;  %v45_v23 = vld [vmem:[%s2491_s8] sm:$0xff] }
 0x4ff   :  { %601 = vadd.xlane.f32.xlu0 %v600_v32  ;;  %v1894_v31 = vmov 5   ;;  %v274_v32 = vstv %s2182_s7 }
 0x58c   :  { %v602_v33 = vpop.xlane.xlu0 %601 }
 0x58d   :  { %v603_v34 = vrot.slane %v602_v33, 4 }
 0x58f   :  { %v604_v35 = vadd.f32 %v603_v34, %v602_v33 }
 0x591   :  { %v605_v36 = vrot.slane %v604_v35, 2 }
 0x593   :  { %v606_v37 = vadd.f32 %v605_v36, %v604_v35  ;;  %v275_v35 = vmul.f32 %v274_v32, %v2153_v48  ;;  %v1896_v48 = vmov 6  }
 0x595   :  { %v607_v38 = vrot.slane %v606_v37, 1 }
 0x597   :  { %v608_v39 = vadd.f32 %v607_v38, %v606_v37  ;;  %v279_v38 = vpop.permute.xlu1 %278 }
 0x599   :  { %1800 = vpush %v608_v39  ;;  %v281_v39 = vmul.f32 %v279_v38, %v275_v35 }
 0x5ca   :  { %s1801_s13 = spop %1800 }
 0x5cb   :  { %s610_s14 = smul.f32 0.0013020834, %s1801_s13 }
 0x5cd   :  { %s611_s1 = sadd.f32 1e-05, %s610_s14 }
 0x5cf   :  { %v612_v44 = vstv %s611_s1 }
 0x5d0   :  { %1853 = vrsqrt.f32 %v612_v44 }
 0x5da   :  { %v1854_v47 = vpop.eup %1853 }
 0x5db   :  { %1802 = vpush %v1854_v47 }
 0x5dc   :  { %1804 = vpush %v793_v49 }
 0x60c   :  { %s2209_s15 = spop %1802 }
 0x60d   :  { %s1805_s2 = spop %1804  ;;  %v615_v47 = vstv %s2209_s15  ;;  %s1900_s15 = smov [#allocation3]  }
 0x60e   :  { %s795_s16 = smul.f32 0.0013020834, %s1805_s2  ;;  %s1230_s2 = sshll.u32 %s1900_s15, 4  ;;  %s1231_s2 = int_to_ptr.vmem [resolvable:$true] %s1230_s2 }
 0x60f   :  { %p1867_p1 = scmp.lt.s32.totalorder %s1231_s2, %s1231_s2 }
 0x610   :  { %v796_v50 = vstv %s795_s16 }
 0x611   :  { %v2212_v51 = vsub.f32 %v2120_v26, %v796_v50  ;;  %v1898_v50 = vmov 4  }
 0x613   :  { %v798_v52 = vsel %vm48_vm1, %v2212_v51, 0.0 }
 0x614   :  { %v799_v53 = vmul.f32 %v798_v52, %v798_v52 }
 0x616   :  { %1592 = vmatmul.mubr.f32.vlgmr.msra.gmra.mrb[4].mxu1 %v799_v53 }
 0x617   :  { %1777 = vmatpush3.bf16.msra.mxu1 %v1889_v4  ;;  %1661 = vmatprep.mubr.msk.f32.mxu1 %vm1892_vm0, %v1893_v8 }
 0x618   :  { %1778 = vmatprep.subr.bf16.mxu1 %v1888_v3 }
 0x61b   :  { %1779 = vmatpush3.bf16.msra.mxu1 %v1889_v4 }
 0x61c   :  { %1780 = vmatprep.subr.bf16.mxu1 %v1888_v3 }
 0x61f   :  { %1781 = vmatpush3.bf16.msra.mxu1 %v1889_v4 }
 0x620   :  { %1782 = vmatprep.subr.bf16.mxu1 %v1888_v3 }
 0x623   :  { %1783 = vmatpush3.bf16.msra.mxu1 %v1889_v4 }
 0x624   :  { %1784 = vmatprep.subr.bf16.mxu1 %v1888_v3 }
 0x627   :  { %1785 = vmatpush3.bf16.msra.mxu1 %v1889_v4 }
 0x628   :  { %1786 = vmatprep.subr.bf16.mxu1 %v1888_v3 }
 0x62b   :  { %1787 = vmatpush3.bf16.msra.mxu1 %v1889_v4 }
 0x62c   :  { %1788 = vmatprep.subr.bf16.mxu1 %v1888_v3 }
 0x62f   :  { %1789 = vmatpush3.bf16.msra.mxu1 %v1889_v4 }
 0x630   :  { %1790 = vmatprep.subr.bf16.mxu1 %v1888_v3  ;;  %v1060_v3 = vrot.slane %v1059_v11, 2 }
 0x632   :  { %v1061_v13 = vadd.f32 %v1060_v3, %v1059_v11 }
 0x633   :  { %1791 = vmatpush3.bf16.msra.mxu1 %v1889_v4 }
 0x634   :  { %v1062_v14 = vrot.slane %v1061_v13, 1 }
 0x636   :  { %v1063_v21 = vadd.f32 %v1062_v14, %v1061_v13 }
 0x6e9   :  { %v866_v8 = vpop.f32.mrb[4].mxu1 }
 0x6ea   :  { %v1593_v26 = vpop.f32.mrb[5].mxu1  ;;  %v870_v54 = vsel %vm173_vm6, %v866_v8, 0.0 }
 0x6eb   :  { %871 = vadd.xlane.f32.xlu0 %v870_v54 }
 0x778   :  { %v872_v55 = vpop.xlane.xlu0 %871 }
 0x779   :  { %v873_v58 = vrot.slane %v872_v55, 4 }
 0x77b   :  { %v874_v59 = vadd.f32 %v873_v58, %v872_v55 }
 0x77d   :  { %v875_v60 = vrot.slane %v874_v59, 2 }
 0x77f   :  { %v876_v62 = vadd.f32 %v875_v60, %v874_v59  ;;  %v41_v60 = vld [vmem:[%s2487_s4] sm:$0xf] }
 0x781   :  { %v877_v63 = vrot.slane %v876_v62, 1 }
 0x783   :  { %v878_v0 = vadd.f32 %v877_v63, %v876_v62 }
 0x785   :  { %1806 = vpush %v878_v0 }
 0x7b6   :  { %s1807_s17 = spop %1806 }
 0x7b7   :  { %s880_s18 = smul.f32 0.0013020834, %s1807_s17 }
 0x7b9   :  { %s881_s19 = sadd.f32 1e-05, %s880_s18  ;;  %s1862_s18 = scalar_lea.vmem %s1231_s2, 256 }
 0x7ba   :  { %p1863_p0 = scmp.ne.s32.totalorder %s1231_s2, %s1862_s18  ;;  %p1868_p2 = scmp.lt.s32.totalorder %s1862_s18, %s1862_s18 }
 0x7bb   :  { %v882_v4 = vstv %s881_s19 }
 0x7bc   :  { %1855 = vrsqrt.f32 %v882_v4  ;;  %p1869_p3 = por %p1868_p2, %p1867_p1 }
 0x7be   :  { %p1870_p4 = pnand %p1869_p3, %p1863_p0 }
 0x7c6   :  { %v1856_v20 = vpop.eup %1855 }
 0x7c7   :  { %1808 = vpush %v1856_v20 }
 0x7c8   :  { %1810 = vpush %v1063_v21 }
 0x7f8   :  { %s2235_s20 = spop %1808 }
 0x7f9   :  { %s1811_s21 = spop %1810  ;;  %v885_v49 = vstv %s2235_s20 }
 0x7fa   :  { %s1065_s22 = smul.f32 0.0013020834, %s1811_s21  ;;  %v886_v53 = vmul.f32 %v885_v49, %v2212_v51 }
 0x7fc   :  { %v1066_v18 = vstv %s1065_s22  ;;  %v887_v26 = vmul.f32 %v886_v53, %v279_v38 }
 0x7fd   :  { %v2238_v22 = vsub.f32 %v2145_v29, %v1066_v18  ;;  %v2251_v29 = vld [vmem:[%s2486_s3] sm:$0xf]  ;;  %s1895_s3 = smov 2  }
 0x7ff   :  { %v1068_v19 = vsel %vm48_vm1, %v2238_v22, 0.0 }
 0x800   :  { %v1069_v24 = vmul.f32 %v1068_v19, %v1068_v19 }
 0x802   :  { %1662 = vmatmul.mubr.f32.vlgmr.msra.gmra.mrb[6].mxu1 %v1069_v24 }
 0x8d5   :  { %v1136_v25 = vpop.f32.mrb[6].mxu1 }
 0x8d6   :  { %v1663_v28 = vpop.f32.mrb[7].mxu1  ;;  %v1140_v30 = vsel %vm173_vm6, %v1136_v25, 0.0 }
 0x8d7   :  { %1141 = vadd.xlane.f32.xlu0 %v1140_v30 }
 0x8ed   :  { %284 = vperm.xlu0 %1838, %v45_v23  }
 0x8f1   :  { %1843 = vset.pattern.permute.xlu0 %v1887_v2 }
 0x8f2   :  { %348 = vperm.xlu0 %1843, %v2251_v29  }
 0x8f6   :  { %1846 = vset.pattern.permute.xlu0 %v1894_v31 }
 0x8f7   :  { %378 = vperm.xlu0 %1846, %v2251_v29  }
 0x8fb   :  { %1847 = vset.pattern.permute.xlu0 %v1896_v48 }
 0x964   :  { %v1142_v33 = vpop.xlane.xlu0 %1141 }
 0x965   :  { %v1143_v34 = vrot.slane %v1142_v33, 4 }
 0x967   :  { %v1144_v36 = vadd.f32 %v1143_v34, %v1142_v33 }
 0x969   :  { %v1145_v37 = vrot.slane %v1144_v36, 2 }
 0x96b   :  { %v1146_v40 = vadd.f32 %v1145_v37, %v1144_v36 }
 0x96c   :  { %v285_v41 = vpop.permute.xlu0 %284 }
 0x96d   :  { %v2257_v42 = vadd.f32 %v285_v41, %v281_v39  ;;  %v1147_v43 = vrot.slane %v1146_v40, 1  ;;  %v2283_v54 = vadd.f32 %v887_v26, %v285_v41 }
 0x96f   :  { %288 = vrot.lane.b32.xlu1 %v2257_v42, %s1895_s3  ;;  %v1148_v44 = vadd.f32 %v1147_v43, %v1146_v40 }
 0x971   :  { %1812 = vpush %v1148_v44  ;;  %v2333_v40 = vpop.permute.xlu0 %348 }
 0x973   :  { %296 = vperm.xlu1 %1837, %v42_v45  }
 0x976   :  { %v2339_v43 = vpop.permute.xlu0 %378 }
 0x977   :  { %1839 = vset.pattern.permute.xlu1 %v1890_v5 }
 0x978   :  { %301 = vperm.xlu1 %1839, %v42_v45  }
 0x97c   :  { %306 = vrot.lane.b32.xlu1 %v2257_v42, %s1897_s27 }
 0x97d   :  { %1840 = vset.pattern.permute.xlu1 %v1887_v2  ;;  %v616_v2 = vmul.f32 %v615_v47, %v2185_v27 }
 0x97f   :  { %v617_v52 = vmul.f32 %v616_v2, %v279_v38 }
 0x980   :  { %313 = vperm.xlu1 %1840, %v42_v45  }
 0x981   :  { %v618_v8 = vadd.f32 %v617_v52, %v285_v41 }
 0x984   :  { %1841 = vset.pattern.permute.xlu1 %v1886_v1 }
 0x985   :  { %320 = vperm.xlu1 %1841, %v43_v46  }
 0x989   :  { %329 = vperm.xlu1 %1841, %v2251_v29  }
 0x98d   :  { %1842 = vset.pattern.permute.xlu1 %v1890_v5  ;;  %v1899_v5 = vmov 7  }
 0x98e   :  { %338 = vperm.xlu1 %1842, %v2251_v29  }
 0x992   :  { %1844 = vset.pattern.permute.xlu1 %v1891_v6 }
 0x993   :  { %358 = vperm.xlu1 %1844, %v2251_v29  }
 0x997   :  { %1845 = vset.pattern.permute.xlu1 %v1898_v50 }
 0x998   :  { %368 = vperm.xlu1 %1845, %v2251_v29  }
 0x99c   :  { %619 = vrot.lane.b32.xlu1 %v618_v8, %s1895_s3 }
 0x99d   :  { %1848 = vset.pattern.permute.xlu1 %v1899_v5 }
 0x9a0   :  { %889 = vrot.lane.b32.xlu1 %v2283_v54, %s1895_s3 }
 0x9a2   :  { %s1813_s5 = spop %1812 }
 0x9a3   :  { %s1150_s6 = smul.f32 0.0013020834, %s1813_s5 }
 0x9a4   :  { %625 = vrot.lane.b32.xlu1 %v618_v8, %s1897_s27 }
 0x9a5   :  { %s1151_s30 = sadd.f32 1e-05, %s1150_s6 }
 0x9a7   :  { %v1152_v6 = vstv %s1151_s30 }
 0x9a8   :  { %1857 = vrsqrt.f32 %v1152_v6 }
 0x9b2   :  { %v1858_v27 = vpop.eup %1857 }
 0x9b3   :  { %1814 = vpush %v1858_v27 }
 0x9e1   :  { %v289_v62 = vpop.permute.xlu1 %288 }
 0x9e2   :  { %v293_v25 = vsel %vm290_vm7, %v289_v62, 0.0  ;;  %v2365_v62 = vsub.s32 4, %v2008_v10 }
 0x9e4   :  { %s1815_s7 = spop %1814 }
 0x9e5   :  { %v1155_v51 = vstv %s1815_s7 }
 0x9e6   :  { %v1156_v55 = vmul.f32 %v1155_v51, %v2238_v22 }
 0x9e8   :  { %v1157_v58 = vmul.f32 %v1156_v55, %v279_v38 }
 0x9ea   :  { %v2289_v59 = vadd.f32 %v1157_v58, %v285_v41 }
 0x9ec   :  { %1159 = vrot.lane.b32.xlu0 %v2289_v59, %s1895_s3  ;;  %1165 = vrot.lane.b32.xlu1 %v2289_v59, %s1897_s27 }
 0x9f0   :  { %895 = vrot.lane.b32.xlu0 %v2283_v54, %s1897_s27  ;;  %398 = vperm.xlu1 %1848, %v2251_v29  }
 0x9f2   :  { %v297_v63 = vpop.permute.xlu1 %296 }
 0x9f4   :  { %388 = vperm.xlu0 %1847, %v2251_v29   ;;  %1849 = vset.pattern.permute.xlu1 %v1886_v1  ;;  %v299_v29 = vmul.f32 %v297_v63, %v293_v25 }
 0x9f5   :  { %409 = vperm.xlu1 %1849, %v41_v60  }
 0x9f7   :  { %v302_v0 = vpop.permute.xlu1 %301 }
 0x9f8   :  { %1850 = vset.pattern.permute.xlu0 %v1886_v1  ;;  %v304_v24 = vmul.f32 %v302_v0, %v2257_v42  ;;  %v623_v30 = vmul.f32 %v618_v8, %v302_v0  ;;  %v1163_v55 = vmul.f32 %v2289_v59, %v302_v0 }
 0x9fa   :  { %v305_v33 = vadd.f32 %v304_v24, %v299_v29 }
 0x9fb   :  { %v307_v7 = vpop.permute.xlu1 %306 }
 0x9fc   :  { %v311_v28 = vsel %vm308_vm8, %v307_v7, 0.0  ;;  %v893_v7 = vmul.f32 %v2283_v54, %v302_v0  ;;  %v2379_v0 = vsub.s32 5, %v2008_v10 }
 0x9ff   :  { %v2304_v9 = vpop.permute.xlu1 %313 }
 0xa00   :  { %v316_v31 = vmul.f32 %v2304_v9, %v311_v28 }
 0xa02   :  { %v317_v35 = vadd.f32 %v316_v31, %v305_v33 }
 0xa04   :  { %v2306_v11 = vpop.permute.xlu1 %320 }
 0xa05   :  { %v323_v37 = vadd.f32 %v2306_v11, %v317_v35 }
 0xa07   :  { %v325_v39 = vmul.f32 %v323_v37, %v2052_v57  ;;  %vm324_vm10 = vcmp.gt.f32.partialorder %v323_v37, 0.0 }
 0xa08   :  { %v2308_v3 = vpop.permute.xlu1 %329 }
 0xa09   :  { %v2337_v42 = vsel %vm324_vm10, %v323_v37, %v325_v39  ;;  %v2394_v39 = vsub.s32 7, %v2008_v10 }
 0xa0a   :  { %v335_v48 = vrot.slane %v2337_v42, %v2014_v12  ;;  %v344_v46 = vrot.slane %v2337_v42, %v2026_v16  ;;  %v354_v49 = vrot.slane %v2337_v42, %v2023_v15  ;;  %v374_v29 = vrot.slane %v2337_v42, %v2365_v62 }
 0xa0b   :  { %v384_v37 = vrot.slane %v2337_v42, %v2379_v0 }
 0xa0c   :  { %v336_v26 = vmul.f32 %v335_v48, %v2308_v3 }
 0xa0d   :  { %v2310_v4 = vpop.permute.xlu1 %338 }
 0xa0e   :  { %v345_v2 = vmul.f32 %v344_v46, %v2310_v4 }
 0xa10   :  { %v346_v60 = vadd.f32 %v345_v2, %v336_v26 }
 0xa12   :  { %v2312_v13 = vpop.permute.xlu1 %358 }
 0xa17   :  { %v2314_v14 = vpop.permute.xlu1 %368 }
 0xa1b   :  { %v620_v20 = vpop.permute.xlu1 %619 }
 0xa1c   :  { %v621_v18 = vsel %vm290_vm7, %v620_v20, 0.0 }
 0xa1d   :  { %v622_v19 = vmul.f32 %v621_v18, %v297_v63 }
 0xa1f   :  { %v890_v21 = vpop.permute.xlu1 %889  ;;  %v624_v32 = vadd.f32 %v623_v30, %v622_v19 }
 0xa20   :  { %v891_v47 = vsel %vm290_vm7, %v890_v21, 0.0 }
 0xa21   :  { %v892_v5 = vmul.f32 %v891_v47, %v297_v63 }
 0xa23   :  { %v626_v1 = vpop.permute.xlu1 %625  ;;  %v894_v59 = vadd.f32 %v893_v7, %v892_v5 }
 0xa24   :  { %v627_v22 = vsel %vm308_vm8, %v626_v1, 0.0 }
 0xa25   :  { %v628_v23 = vmul.f32 %v627_v22, %v2304_v9  ;;  %v355_v22 = vmul.f32 %v354_v49, %v2333_v40 }
 0xa27   :  { %v629_v34 = vadd.f32 %v628_v23, %v624_v32  ;;  %v356_v30 = vadd.f32 %v355_v22, %v346_v60 }
 0xa29   :  { %v630_v36 = vadd.f32 %v629_v34, %v2306_v11 }
 0xa2b   :  { %v632_v38 = vmul.f32 %v630_v36, %v2052_v57  ;;  %vm631_vm9 = vcmp.gt.f32.partialorder %v630_v36, 0.0 }
 0xa2d   :  { %v2335_v41 = vsel %vm631_vm9, %v630_v36, %v632_v38 }
 0xa2e   :  { %v637_v44 = vrot.slane %v2335_v41, %v2014_v12  ;;  %v642_v45 = vrot.slane %v2335_v41, %v2026_v16  ;;  %v648_v58 = vrot.slane %v2335_v41, %v2023_v15  ;;  %v654_v54 = vrot.slane %v2335_v41, %v2029_v17 }
 0xa2f   :  { %v660_v33 = vrot.slane %v2335_v41, %v2365_v62  ;;  %v666_v49 = vrot.slane %v2335_v41, %v2379_v0 }
 0xa30   :  { %v638_v53 = vmul.f32 %v637_v44, %v2308_v3  ;;  %v643_v8 = vmul.f32 %v642_v45, %v2310_v4  ;;  %v649_v28 = vmul.f32 %v648_v58, %v2333_v40  ;;  %v655_v36 = vmul.f32 %v654_v54, %v2312_v13 }
 0xa31   :  { %v2397_v44 = vsub.s32 6, %v2008_v10  ;;  %v661_v2 = vmul.f32 %v660_v33, %v2314_v14  ;;  %v385_v10 = vmul.f32 %v384_v37, %v2339_v43  ;;  %v678_v58 = vrot.slane %v2335_v41, %v2394_v39 }
 0xa32   :  { %v644_v18 = vadd.f32 %v643_v8, %v638_v53  ;;  %v404_v8 = vrot.slane %v2337_v42, %v2394_v39  ;;  %v667_v60 = vmul.f32 %v666_v49, %v2339_v43 }
 0xa33   :  { %v394_v26 = vrot.slane %v2337_v42, %v2397_v44 }
 0xa34   :  { %v650_v32 = vadd.f32 %v649_v28, %v644_v18 }
 0xa36   :  { %v656_v46 = vadd.f32 %v655_v36, %v650_v32 }
 0xa38   :  { %v662_v5 = vadd.f32 %v661_v2, %v656_v46 }
 0xa3a   :  { %v668_v22 = vadd.f32 %v667_v60, %v662_v5 }
 0xa5e   :  { %v1160_v50 = vpop.permute.xlu0 %1159  ;;  %v1166_v52 = vpop.permute.xlu1 %1165 }
 0xa5f   :  { %v1161_v6 = vsel %vm290_vm7, %v1160_v50, 0.0  ;;  %v1167_v27 = vsel %vm308_vm8, %v1166_v52, 0.0 }
 0xa60   :  { %v1162_v51 = vmul.f32 %v1161_v6, %v297_v63  ;;  %v1168_v21 = vmul.f32 %v1167_v27, %v2304_v9  ;;  %v364_v63 = vrot.slane %v2337_v42, %v2029_v17 }
 0xa62   :  { %v1164_v20 = vadd.f32 %v1163_v55, %v1162_v51  ;;  %v896_v1 = vpop.permute.xlu0 %895  ;;  %v365_v23 = vmul.f32 %v364_v63, %v2312_v13 }
 0xa63   :  { %v897_v19 = vsel %vm308_vm8, %v896_v1, 0.0 }
 0xa64   :  { %v1169_v24 = vadd.f32 %v1168_v21, %v1164_v20  ;;  %v898_v25 = vmul.f32 %v897_v19, %v2304_v9  ;;  %v375_v9 = vmul.f32 %v374_v29, %v2314_v14  ;;  %v366_v38 = vadd.f32 %v365_v23, %v356_v30 }
 0xa66   :  { %v1170_v56 = vadd.f32 %v1169_v24, %v2306_v11  ;;  %v899_v31 = vadd.f32 %v898_v25, %v894_v59  ;;  %v376_v47 = vadd.f32 %v375_v9, %v366_v38 }
 0xa68   :  { %vm1171_vm11 = vcmp.gt.f32.partialorder %v1170_v56, 0.0  ;;  %v1172_v34 = vmul.f32 %v1170_v56, %v2052_v57  ;;  %v900_v35 = vadd.f32 %v899_v31, %v2306_v11  ;;  %v386_v27 = vadd.f32 %v385_v10, %v376_v47 }
 0xa6a   :  { %v2399_v45 = vsel %vm1171_vm11, %v1170_v56, %v1172_v34  ;;  %vm901_vm12 = vcmp.gt.f32.partialorder %v900_v35, 0.0  ;;  %v902_v48 = vmul.f32 %v900_v35, %v2052_v57 }
 0xa6b   :  { %v1177_v50 = vrot.slane %v2399_v45, %v2014_v12  ;;  %v1182_v6 = vrot.slane %v2399_v45, %v2026_v16  ;;  %v1188_v42 = vrot.slane %v2399_v45, %v2023_v15  ;;  %v1194_v59 = vrot.slane %v2399_v45, %v2029_v17 }
 0xa6c   :  { %v2402_v11 = vsel %vm901_vm12, %v900_v35, %v902_v48  ;;  %v1206_v25 = vrot.slane %v2399_v45, %v2379_v0  ;;  %v1212_v49 = vrot.slane %v2399_v45, %v2397_v44 }
 0xa6d   :  { %v907_v52 = vrot.slane %v2402_v11, %v2014_v12  ;;  %v912_v57 = vrot.slane %v2402_v11, %v2026_v16  ;;  %v918_v53 = vrot.slane %v2402_v11, %v2023_v15  ;;  %v924_v55 = vrot.slane %v2402_v11, %v2029_v17 }
 0xa6e   :  { %v1178_v7 = vmul.f32 %v1177_v50, %v2308_v3  ;;  %v672_v16 = vrot.slane %v2335_v41, %v2397_v44  ;;  %v930_v1 = vrot.slane %v2402_v11, %v2365_v62  ;;  %v1183_v63 = vmul.f32 %v1182_v6, %v2310_v4 }
 0xa6f   :  { %v908_v51 = vmul.f32 %v907_v52, %v2308_v3  ;;  %v913_v12 = vmul.f32 %v912_v57, %v2310_v4  ;;  %v919_v21 = vmul.f32 %v918_v53, %v2333_v40  ;;  %v399_v18 = vpop.permute.xlu1 %398  ;;  %v1200_v3 = vrot.slane %v2399_v45, %v2365_v62 }
 0xa70   :  { %v925_v41 = vmul.f32 %v924_v55, %v2312_v13  ;;  %v936_v24 = vrot.slane %v2402_v11, %v2379_v0  ;;  %v1184_v30 = vadd.f32 %v1183_v63, %v1178_v7  ;;  %v1189_v4 = vmul.f32 %v1188_v42, %v2333_v40 }
 0xa71   :  { %v914_v20 = vadd.f32 %v913_v12, %v908_v51  ;;  %v405_v23 = vmul.f32 %v404_v8, %v399_v18  ;;  %v679_v17 = vmul.f32 %v678_v58, %v399_v18  ;;  %v931_v62 = vmul.f32 %v930_v1, %v2314_v14 }
 0xa72   :  { %v1190_v32 = vadd.f32 %v1189_v4, %v1184_v30  ;;  %v1195_v9 = vmul.f32 %v1194_v59, %v2312_v13  ;;  %v948_v33 = vrot.slane %v2402_v11, %v2394_v39  ;;  %v937_v0 = vmul.f32 %v936_v24, %v2339_v43 }
 0xa73   :  { %v389_v15 = vpop.permute.xlu0 %388  ;;  %v920_v19 = vadd.f32 %v919_v21, %v914_v20  ;;  %v942_v35 = vrot.slane %v2402_v11, %v2397_v44  ;;  %v1201_v37 = vmul.f32 %v1200_v3, %v2314_v14  ;;  %v1207_v2 = vmul.f32 %v1206_v25, %v2339_v43  ;;  %v1859_v14 = vld [vmem:[%s2483_s0] sm:$0xf] }
 0xa74   :  { %v395_v28 = vmul.f32 %v394_v26, %v389_v15  ;;  %v673_v54 = vmul.f32 %v672_v16, %v389_v15  ;;  %v410_v40 = vpop.permute.xlu1 %409  ;;  %v1196_v36 = vadd.f32 %v1195_v9, %v1190_v32  ;;  %v1218_v52 = vrot.slane %v2399_v45, %v2394_v39  ;;  %v1860_v39 = vld [vmem:[%s2483_s0 + $0x8] sm:$0xf] }
 0xa75   :  { %v926_v29 = vadd.f32 %v925_v41, %v920_v19  ;;  %v943_v47 = vmul.f32 %v942_v35, %v389_v15  ;;  %v949_v11 = vmul.f32 %v948_v33, %v399_v18  ;;  %v1213_v8 = vmul.f32 %v1212_v49, %v389_v15 }
 0xa76   :  { %v396_v56 = vadd.f32 %v395_v28, %v386_v27  ;;  %v674_v31 = vadd.f32 %v673_v54, %v668_v22  ;;  %v1202_v13 = vadd.f32 %v1201_v37, %v1196_v36  ;;  %v1219_v6 = vmul.f32 %v1218_v52, %v399_v18 }
 0xa77   :  { %v932_v34 = vadd.f32 %v931_v62, %v926_v29 }
 0xa78   :  { %v406_v38 = vadd.f32 %v405_v23, %v396_v56  ;;  %v680_v48 = vadd.f32 %v679_v17, %v674_v31  ;;  %v1208_v53 = vadd.f32 %v1207_v2, %v1202_v13 }
 0xa79   :  { %v938_v46 = vadd.f32 %v937_v0, %v932_v34 }
 0xa7a   :  { %v412_v50 = vadd.f32 %v410_v40, %v406_v38  ;;  %v681_v10 = vadd.f32 %v680_v48, %v410_v40  ;;  %v1214_v27 = vadd.f32 %v1213_v8, %v1208_v53 }
 0xa7b   :  { %v944_v57 = vadd.f32 %v943_v47, %v938_v46 }
 0xa7c   :  { %v413_v26 = vadd.f32 %v1859_v14, %v412_v50  ;;  %v682_v43 = vadd.f32 %v2068_v61, %v681_v10  ;;  %v1220_v51 = vadd.f32 %v1219_v6, %v1214_v27  ;;  %v1861_v61 = vld [vmem:[%s2483_s0 + $0xc] sm:$0xf] }
 0xa7d   :  { %v950_v5 = vadd.f32 %v949_v11, %v944_v57 }
 0xa7e   :  { %414 = vst [vmem:[#allocation3] sm:$0xf] %v413_v26  ;;  %684 = vst [vmem:[#allocation3 + $0x4] sm:$0xf] %v682_v43  ;;  %v1221_v12 = vadd.f32 %v1220_v51, %v410_v40 }
 0xa7f   :  { %v951_v44 = vadd.f32 %v950_v5, %v410_v40 }
 0xa80   :  { %v1222_v55 = vadd.f32 %v1861_v61, %v1221_v12 }
 0xa81   :  { %v952_v45 = vadd.f32 %v1860_v39, %v951_v44 }
 0xa82   :  { %1224 = vst [vmem:[#allocation3 + $0xc] sm:$0xf] %v1222_v55 }
 0xa83   :  { %954 = vst [vmem:[#allocation3 + $0x8] sm:$0xf] %v952_v45 }
 0xa84   :  { %1873 = shalt.err (!%p1870_p4)
}
 0xa85   :  { %s1874_s21 = scalar_lea.hbm %s2493_s10, 256 }
 0xa86   :  { %p1875_p5 = scmp.ne.s32.totalorder %s2493_s10, %s1874_s21  ;;  %p1878_p6 = scmp.lt.u32.totalorder %s1874_s21, %s2493_s10 }
 0xa88   :  { %p1880_p7 = pnand %p1878_p6, %p1875_p5 }
 0xa8a   :  { %1883 = shalt.err (!%p1880_p7)
}
 0xa8b   :  { %s1901_s24 = smov 64   ;;  %s1902_s25 = smov 4  }
 0xa8c   :  { %1236 = dma.vmem_to_hbm [thread:$0]  %s1231_s2, 256, %s2493_s10, [#allocation4], %s1901_s24, %s1901_s24, %s1902_s25  }
 0xa8d   :  { %1884 = dma.done.wait [#allocation4], 256  }
 0xa8e   :  { %1885 = vsyncadd [#allocation4], 4294967040 }
 0xa8f   :  { %1240 = vsyncpa [#allocation4], 1 }

</bundles_post_ra>
